<compile_context>
chip_gen: v5e
topology: v5e:2x2
jax: 0.10.0
libtpu: 0.0.40
codegen_flags: <defaults>
</compile_context>

<pallas_src>
import jax
import jax.numpy as jnp
import numpy as np
from jax import lax
from jax.experimental import pallas as pl
from jax.experimental.pallas import tpu as pltpu

N, H, W = 2, 16, 16
PLANES = 4
INPLANES = 4 * PLANES            # residual path requires inplanes == planes * 4
M = N * H * W                    # 512 = 4 * 128  -> lane-dense
EPS = 1e-5

# Parameter-slab layout (rows x cols = 24 x 38), packed wrapper-side into ONE array:
_R1 = (0, PLANES)                              # conv1 / bn1 rows
_R2 = (PLANES, 2 * PLANES)                     # conv2 / bn2 rows
_R3 = (2 * PLANES, 2 * PLANES + INPLANES)      # conv3 / bn3 rows
_GCOL = 9 * PLANES                             # gamma column (36)
_BCOL = _GCOL + 1                              # beta  column (37)
_PROWS = 2 * PLANES + INPLANES                 # 24
_PCOLS = _BCOL + 1                             # 38


def bottleneck_kernel(x_ref, p_ref, mask_ref, o_ref):
    x = x_ref[...]                                   # (INPLANES, M)
    ones_m = jnp.ones((M, 1), jnp.float32)           # MXU reduction vector (splat constant)

    def bn(y, rows, relu):
        r0, r1 = rows
        g = p_ref[r0:r1, _GCOL:_GCOL + 1]            # (C, 1)
        b = p_ref[r0:r1, _BCOL:_BCOL + 1]            # (C, 1)
        # Batch sums on the idle MXU instead of the XLU (which is busy with the rolls).
        s1 = jnp.dot(y, ones_m, preferred_element_type=jnp.float32)        # (C, 1)
        s2 = jnp.dot(y * y, ones_m, preferred_element_type=jnp.float32)    # (C, 1)
        mean = s1 * (1.0 / M)
        var = jnp.maximum(s2 * (1.0 / M) - mean * mean, 0.0)
        scale = g * lax.rsqrt(var + EPS)             # EUP rsqrt (free slot)
        shift = b - mean * scale
        out = y * scale + shift
        return jnp.maximum(out, 0.0) if relu else out

    # ---- conv1 (1x1, no bias) + bn1 + relu : one MXU matmul ----
    w1 = p_ref[_R1[0]:_R1[1], 0:INPLANES]            # (PLANES, INPLANES)
    h1 = bn(jnp.dot(w1, x, preferred_element_type=jnp.float32), _R1, True)

    # ---- conv2 (3x3, stride=1, pad=1, no bias) + bn2 + relu ----
    # 9 register-resident taps: lane roll (XLU) + precomputed boundary mask (one VPU mul),
    # each feeding a small K=PLANES MXU matmul.  No im2col scratch round-trip.
    h2 = jnp.zeros((PLANES, M), jnp.float32)
    for k in range(9):
        dy, dx = k // 3 - 1, k % 3 - 1
        s = dy * W + dx                              # flat-index offset of this tap
        if s == 0:
            tap = h1                                 # center tap: no roll, mask == 1
        else:
            # tap[:, m] = h1[:, m + s], zeroed where (y+dy, x+dx) falls outside the image
            tap = pltpu.roll(h1, (-s) % M, axis=1) * mask_ref[k:k + 1, :]
        w2k = p_ref[_R2[0]:_R2[1], k * PLANES:(k + 1) * PLANES]   # (PLANES, PLANES)
        h2 = h2 + jnp.dot(w2k, tap, preferred_element_type=jnp.float32)
    h2 = bn(h2, _R2, True)

    # ---- conv3 (1x1, no bias) + bn3 : one MXU matmul ----
    w3 = p_ref[_R3[0]:_R3[1], 0:PLANES]              # (INPLANES, PLANES)
    h3 = bn(jnp.dot(w3, h2, preferred_element_type=jnp.float32), _R3, False)

    # ---- residual add + relu (downsample is None) : lane-dense unmasked store ----
    o_ref[...] = jnp.maximum(h3 + x, 0.0)


def _boundary_masks():
    """(9, M) f32 constant: 1 where the 3x3 tap (dy,dx) stays inside the HxW image."""
    yy, xx = np.meshgrid(np.arange(H), np.arange(W), indexing="ij")
    mask = np.zeros((9, M), np.float32)
    for k in range(9):
        dy, dx = k // 3 - 1, k % 3 - 1
        valid = ((yy + dy >= 0) & (yy + dy < H) & (xx + dx >= 0) & (xx + dx < W))
        mask[k] = np.tile(valid.reshape(-1).astype(np.float32), N)
    return jnp.asarray(mask)


def _pack_params(w1, g1, b1, w2, g2, b2, w3, g3, b3):
    """Pack all conv weights + BN gamma/beta into one (24, 38) slab -> a single input DMA."""
    p = jnp.zeros((_PROWS, _PCOLS), jnp.float32)
    p = p.at[_R1[0]:_R1[1], 0:INPLANES].set(w1.reshape(PLANES, INPLANES))
    p = p.at[_R2[0]:_R2[1], 0:9 * PLANES].set(
        w2.transpose(0, 2, 3, 1).reshape(PLANES, 9 * PLANES))   # [co, (ky*3+kx)*Cin + ci]
    p = p.at[_R3[0]:_R3[1], 0:PLANES].set(w3.reshape(INPLANES, PLANES))
    p = p.at[_R1[0]:_R1[1], _GCOL].set(g1)
    p = p.at[_R1[0]:_R1[1], _BCOL].set(b1)
    p = p.at[_R2[0]:_R2[1], _GCOL].set(g2)
    p = p.at[_R2[0]:_R2[1], _BCOL].set(b2)
    p = p.at[_R3[0]:_R3[1], _GCOL].set(g3)
    p = p.at[_R3[0]:_R3[1], _BCOL].set(b3)
    return p


def bottleneck(x_nchw, torch_params):
    """x_nchw: (N, INPLANES, H, W) f32.  torch_params: weights in exact PyTorch layouts."""
    # Wrapper-side repacking (layout plumbing stays in XLA; kernel sees lane-dense slabs).
    x_cm = x_nchw.transpose(1, 0, 2, 3).reshape(INPLANES, M)    # (C, M), M = N*H*W
    p = _pack_params(*torch_params)
    mask = _boundary_masks()

    vm = pl.BlockSpec(memory_space=pltpu.MemorySpace.VMEM)
    out_cm = pl.pallas_call(
        bottleneck_kernel,
        out_shape=jax.ShapeDtypeStruct((INPLANES, M), jnp.float32),
        in_specs=[vm, vm, vm],
        out_specs=vm,
        input_output_aliases={0: 0},     # x / out: same shape+dtype, x only read
    )(x_cm, p, mask)

    return out_cm.reshape(INPLANES, N, H, W).transpose(1, 0, 2, 3)   # back to NCHW


def ref_forward(x, w1, g1, b1, w2, g2, b2, w3, g3, b3):
    """Pure-JAX reference of the PyTorch forward (NCHW, OIHW weights, training-mode BN)."""
    def bn(y, g, b):
        m_ = y.mean(axis=(0, 2, 3), keepdims=True)
        v_ = ((y - m_) ** 2).mean(axis=(0, 2, 3), keepdims=True)
        return (y - m_) * lax.rsqrt(v_ + EPS) * g.reshape(1, -1, 1, 1) + b.reshape(1, -1, 1, 1)

    dn = ('NCHW', 'OIHW', 'NCHW')
    h = jax.nn.relu(bn(lax.conv_general_dilated(
        x, w1, (1, 1), 'VALID', dimension_numbers=dn), g1, b1))
    h = jax.nn.relu(bn(lax.conv_general_dilated(
        h, w2, (1, 1), [(1, 1), (1, 1)], dimension_numbers=dn), g2, b2))
    h = bn(lax.conv_general_dilated(
        h, w3, (1, 1), 'VALID', dimension_numbers=dn), g3, b3)
    return jax.nn.relu(h + x)


if __name__ == "__main__":
    key = jax.random.PRNGKey(0)
    ks = jax.random.split(key, 10)

    # Parameters in the exact PyTorch layouts from Bottleneck.__init__ (planes=4, inplanes=16):
    w1 = jax.random.normal(ks[0], (PLANES, INPLANES, 1, 1), jnp.float32) * 0.1   # conv1.weight (OIHW)
    w2 = jax.random.normal(ks[1], (PLANES, PLANES, 3, 3), jnp.float32) * 0.1     # conv2.weight (OIHW)
    w3 = jax.random.normal(ks[2], (INPLANES, PLANES, 1, 1), jnp.float32) * 0.1   # conv3.weight (OIHW)
    g1 = 1.0 + 0.1 * jax.random.normal(ks[3], (PLANES,), jnp.float32)
    b1 = 0.1 * jax.random.normal(ks[4], (PLANES,), jnp.float32)
    g2 = 1.0 + 0.1 * jax.random.normal(ks[5], (PLANES,), jnp.float32)
    b2 = 0.1 * jax.random.normal(ks[6], (PLANES,), jnp.float32)
    g3 = 1.0 + 0.1 * jax.random.normal(ks[7], (INPLANES,), jnp.float32)
    b3 = 0.1 * jax.random.normal(ks[8], (INPLANES,), jnp.float32)

    x = jax.random.normal(ks[9], (N, INPLANES, H, W), jnp.float32)               # NCHW like PyTorch

    params = (w1, g1, b1, w2, g2, b2, w3, g3, b3)
    out = jax.block_until_ready(jax.jit(bottleneck)(x, params))
    ref = jax.block_until_ready(ref_forward(x, *params))
    np.testing.assert_allclose(np.asarray(out), np.asarray(ref), rtol=2e-3, atol=2e-3)

    print("KERNEL_OK")
</pallas_src>

<mosaic_0001>
module attributes {stable_mosaic.version = 11 : i64} {
  func.func @bottleneck_kernel(%arg0: memref<16x512xf32, #tpu.memory_space<vmem>>, %arg1: memref<24x38xf32, #tpu.memory_space<vmem>>, %arg2: memref<9x512xf32, #tpu.memory_space<vmem>>, %arg3: memref<16x512xf32, #tpu.memory_space<vmem>>) attributes {dimension_semantics = [], scalar_prefetch = 0 : i64, scratch_operands = 0 : i64, tpu.core_type = #tpu.core_type<tc>} {
    %c0 = arith.constant 0 : index
    %c0_0 = arith.constant 0 : index
    %0 = vector.load %arg0[%c0, %c0_0] : memref<16x512xf32, #tpu.memory_space<vmem>>, vector<16x512xf32>
    %cst = arith.constant 1.000000e+00 : f32
    %1 = vector.broadcast %cst : f32 to vector<512x1xf32>
    %c0_1 = arith.constant 0 : index
    %c0_2 = arith.constant 0 : index
    %2 = vector.load %arg1[%c0_1, %c0_2] : memref<24x38xf32, #tpu.memory_space<vmem>>, vector<4x16xf32>
    %cst_3 = arith.constant dense<0.000000e+00> : vector<4x512xf32>
    %3 = tpu.matmul %2, %0, %cst_3 {dimension_numbers = #tpu.dot_dimension_numbers<[1], [0], [0], [1], [0, 0, 1, 1], [], []>} : vector<4x16xf32>, vector<16x512xf32>, vector<4x512xf32> -> vector<4x512xf32>
    %c0_4 = arith.constant 0 : index
    %c36 = arith.constant 36 : index
    %4 = vector.load %arg1[%c0_4, %c36] : memref<24x38xf32, #tpu.memory_space<vmem>>, vector<4x1xf32>
    %c0_5 = arith.constant 0 : index
    %c37 = arith.constant 37 : index
    %5 = vector.load %arg1[%c0_5, %c37] : memref<24x38xf32, #tpu.memory_space<vmem>>, vector<4x1xf32>
    %cst_6 = arith.constant dense<0.000000e+00> : vector<4x1xf32>
    %6 = tpu.matmul %3, %1, %cst_6 {dimension_numbers = #tpu.dot_dimension_numbers<[1], [0], [0], [1], [0, 0, 1, 1], [], []>} : vector<4x512xf32>, vector<512x1xf32>, vector<4x1xf32> -> vector<4x1xf32>
    %7 = arith.mulf %3, %3 : vector<4x512xf32>
    %cst_7 = arith.constant dense<0.000000e+00> : vector<4x1xf32>
    %8 = tpu.matmul %7, %1, %cst_7 {dimension_numbers = #tpu.dot_dimension_numbers<[1], [0], [0], [1], [0, 0, 1, 1], [], []>} : vector<4x512xf32>, vector<512x1xf32>, vector<4x1xf32> -> vector<4x1xf32>
    %cst_8 = arith.constant 0.001953125 : f32
    %9 = vector.broadcast %cst_8 : f32 to vector<4x1xf32>
    %10 = arith.mulf %6, %9 : vector<4x1xf32>
    %cst_9 = arith.constant 0.001953125 : f32
    %11 = vector.broadcast %cst_9 : f32 to vector<4x1xf32>
    %12 = arith.mulf %8, %11 : vector<4x1xf32>
    %13 = arith.mulf %10, %10 : vector<4x1xf32>
    %14 = arith.subf %12, %13 : vector<4x1xf32>
    %cst_10 = arith.constant 0.000000e+00 : f32
    %15 = vector.broadcast %cst_10 : f32 to vector<4x1xf32>
    %16 = arith.maximumf %14, %15 : vector<4x1xf32>
    %cst_11 = arith.constant 9.99999974E-6 : f32
    %17 = vector.broadcast %cst_11 : f32 to vector<4x1xf32>
    %18 = arith.addf %16, %17 : vector<4x1xf32>
    %19 = math.rsqrt %18 : vector<4x1xf32>
    %20 = arith.mulf %4, %19 : vector<4x1xf32>
    %21 = arith.mulf %10, %20 : vector<4x1xf32>
    %22 = arith.subf %5, %21 : vector<4x1xf32>
    %23 = vector.broadcast %20 : vector<4x1xf32> to vector<4x512xf32>
    %24 = arith.mulf %3, %23 : vector<4x512xf32>
    %25 = vector.broadcast %22 : vector<4x1xf32> to vector<4x512xf32>
    %26 = arith.addf %24, %25 : vector<4x512xf32>
    %cst_12 = arith.constant 0.000000e+00 : f32
    %27 = vector.broadcast %cst_12 : f32 to vector<4x512xf32>
    %28 = arith.maximumf %26, %27 : vector<4x512xf32>
    %cst_13 = arith.constant 0.000000e+00 : f32
    %29 = vector.broadcast %cst_13 : f32 to vector<4x512xf32>
    %c17_i32 = arith.constant 17 : i32
    %30 = tpu.dynamic_rotate %28 by %c17_i32 dim 1 : vector<4x512xf32>, i32 -> vector<4x512xf32>
    %c0_14 = arith.constant 0 : index
    %c0_15 = arith.constant 0 : index
    %31 = vector.load %arg2[%c0_14, %c0_15] : memref<9x512xf32, #tpu.memory_space<vmem>>, vector<1x512xf32>
    %32 = vector.broadcast %31 : vector<1x512xf32> to vector<4x512xf32>
    %33 = arith.mulf %30, %32 : vector<4x512xf32>
    %c4 = arith.constant 4 : index
    %c0_16 = arith.constant 0 : index
    %34 = vector.load %arg1[%c4, %c0_16] : memref<24x38xf32, #tpu.memory_space<vmem>>, vector<4x4xf32>
    %cst_17 = arith.constant dense<0.000000e+00> : vector<4x512xf32>
    %35 = tpu.matmul %34, %33, %cst_17 {dimension_numbers = #tpu.dot_dimension_numbers<[1], [0], [0], [1], [0, 0, 1, 1], [], []>} : vector<4x4xf32>, vector<4x512xf32>, vector<4x512xf32> -> vector<4x512xf32>
    %36 = arith.addf %29, %35 : vector<4x512xf32>
    %c16_i32 = arith.constant 16 : i32
    %37 = tpu.dynamic_rotate %28 by %c16_i32 dim 1 : vector<4x512xf32>, i32 -> vector<4x512xf32>
    %c1 = arith.constant 1 : index
    %c0_18 = arith.constant 0 : index
    %38 = vector.load %arg2[%c1, %c0_18] : memref<9x512xf32, #tpu.memory_space<vmem>>, vector<1x512xf32>
    %39 = vector.broadcast %38 : vector<1x512xf32> to vector<4x512xf32>
    %40 = arith.mulf %37, %39 : vector<4x512xf32>
    %c4_19 = arith.constant 4 : index
    %c4_20 = arith.constant 4 : index
    %41 = vector.load %arg1[%c4_19, %c4_20] : memref<24x38xf32, #tpu.memory_space<vmem>>, vector<4x4xf32>
    %cst_21 = arith.constant dense<0.000000e+00> : vector<4x512xf32>
    %42 = tpu.matmul %41, %40, %cst_21 {dimension_numbers = #tpu.dot_dimension_numbers<[1], [0], [0], [1], [0, 0, 1, 1], [], []>} : vector<4x4xf32>, vector<4x512xf32>, vector<4x512xf32> -> vector<4x512xf32>
    %43 = arith.addf %36, %42 : vector<4x512xf32>
    %c15_i32 = arith.constant 15 : i32
    %44 = tpu.dynamic_rotate %28 by %c15_i32 dim 1 : vector<4x512xf32>, i32 -> vector<4x512xf32>
    %c2 = arith.constant 2 : index
    %c0_22 = arith.constant 0 : index
    %45 = vector.load %arg2[%c2, %c0_22] : memref<9x512xf32, #tpu.memory_space<vmem>>, vector<1x512xf32>
    %46 = vector.broadcast %45 : vector<1x512xf32> to vector<4x512xf32>
    %47 = arith.mulf %44, %46 : vector<4x512xf32>
    %c4_23 = arith.constant 4 : index
    %c8 = arith.constant 8 : index
    %48 = vector.load %arg1[%c4_23, %c8] : memref<24x38xf32, #tpu.memory_space<vmem>>, vector<4x4xf32>
    %cst_24 = arith.constant dense<0.000000e+00> : vector<4x512xf32>
    %49 = tpu.matmul %48, %47, %cst_24 {dimension_numbers = #tpu.dot_dimension_numbers<[1], [0], [0], [1], [0, 0, 1, 1], [], []>} : vector<4x4xf32>, vector<4x512xf32>, vector<4x512xf32> -> vector<4x512xf32>
    %50 = arith.addf %43, %49 : vector<4x512xf32>
    %c1_i32 = arith.constant 1 : i32
    %51 = tpu.dynamic_rotate %28 by %c1_i32 dim 1 : vector<4x512xf32>, i32 -> vector<4x512xf32>
    %c3 = arith.constant 3 : index
    %c0_25 = arith.constant 0 : index
    %52 = vector.load %arg2[%c3, %c0_25] : memref<9x512xf32, #tpu.memory_space<vmem>>, vector<1x512xf32>
    %53 = vector.broadcast %52 : vector<1x512xf32> to vector<4x512xf32>
    %54 = arith.mulf %51, %53 : vector<4x512xf32>
    %c4_26 = arith.constant 4 : index
    %c12 = arith.constant 12 : index
    %55 = vector.load %arg1[%c4_26, %c12] : memref<24x38xf32, #tpu.memory_space<vmem>>, vector<4x4xf32>
    %cst_27 = arith.constant dense<0.000000e+00> : vector<4x512xf32>
    %56 = tpu.matmul %55, %54, %cst_27 {dimension_numbers = #tpu.dot_dimension_numbers<[1], [0], [0], [1], [0, 0, 1, 1], [], []>} : vector<4x4xf32>, vector<4x512xf32>, vector<4x512xf32> -> vector<4x512xf32>
    %57 = arith.addf %50, %56 : vector<4x512xf32>
    %c4_28 = arith.constant 4 : index
    %c16 = arith.constant 16 : index
    %58 = vector.load %arg1[%c4_28, %c16] : memref<24x38xf32, #tpu.memory_space<vmem>>, vector<4x4xf32>
    %cst_29 = arith.constant dense<0.000000e+00> : vector<4x512xf32>
    %59 = tpu.matmul %58, %28, %cst_29 {dimension_numbers = #tpu.dot_dimension_numbers<[1], [0], [0], [1], [0, 0, 1, 1], [], []>} : vector<4x4xf32>, vector<4x512xf32>, vector<4x512xf32> -> vector<4x512xf32>
    %60 = arith.addf %57, %59 : vector<4x512xf32>
    %c511_i32 = arith.constant 511 : i32
    %61 = tpu.dynamic_rotate %28 by %c511_i32 dim 1 : vector<4x512xf32>, i32 -> vector<4x512xf32>
    %c5 = arith.constant 5 : index
    %c0_30 = arith.constant 0 : index
    %62 = vector.load %arg2[%c5, %c0_30] : memref<9x512xf32, #tpu.memory_space<vmem>>, vector<1x512xf32>
    %63 = vector.broadcast %62 : vector<1x512xf32> to vector<4x512xf32>
    %64 = arith.mulf %61, %63 : vector<4x512xf32>
    %c4_31 = arith.constant 4 : index
    %c20 = arith.constant 20 : index
    %65 = vector.load %arg1[%c4_31, %c20] : memref<24x38xf32, #tpu.memory_space<vmem>>, vector<4x4xf32>
    %cst_32 = arith.constant dense<0.000000e+00> : vector<4x512xf32>
    %66 = tpu.matmul %65, %64, %cst_32 {dimension_numbers = #tpu.dot_dimension_numbers<[1], [0], [0], [1], [0, 0, 1, 1], [], []>} : vector<4x4xf32>, vector<4x512xf32>, vector<4x512xf32> -> vector<4x512xf32>
    %67 = arith.addf %60, %66 : vector<4x512xf32>
    %c497_i32 = arith.constant 497 : i32
    %68 = tpu.dynamic_rotate %28 by %c497_i32 dim 1 : vector<4x512xf32>, i32 -> vector<4x512xf32>
    %c6 = arith.constant 6 : index
    %c0_33 = arith.constant 0 : index
    %69 = vector.load %arg2[%c6, %c0_33] : memref<9x512xf32, #tpu.memory_space<vmem>>, vector<1x512xf32>
    %70 = vector.broadcast %69 : vector<1x512xf32> to vector<4x512xf32>
    %71 = arith.mulf %68, %70 : vector<4x512xf32>
    %c4_34 = arith.constant 4 : index
    %c24 = arith.constant 24 : index
    %72 = vector.load %arg1[%c4_34, %c24] : memref<24x38xf32, #tpu.memory_space<vmem>>, vector<4x4xf32>
    %cst_35 = arith.constant dense<0.000000e+00> : vector<4x512xf32>
    %73 = tpu.matmul %72, %71, %cst_35 {dimension_numbers = #tpu.dot_dimension_numbers<[1], [0], [0], [1], [0, 0, 1, 1], [], []>} : vector<4x4xf32>, vector<4x512xf32>, vector<4x512xf32> -> vector<4x512xf32>
    %74 = arith.addf %67, %73 : vector<4x512xf32>
    %c496_i32 = arith.constant 496 : i32
    %75 = tpu.dynamic_rotate %28 by %c496_i32 dim 1 : vector<4x512xf32>, i32 -> vector<4x512xf32>
    %c7 = arith.constant 7 : index
    %c0_36 = arith.constant 0 : index
    %76 = vector.load %arg2[%c7, %c0_36] : memref<9x512xf32, #tpu.memory_space<vmem>>, vector<1x512xf32>
    %77 = vector.broadcast %76 : vector<1x512xf32> to vector<4x512xf32>
    %78 = arith.mulf %75, %77 : vector<4x512xf32>
    %c4_37 = arith.constant 4 : index
    %c28 = arith.constant 28 : index
    %79 = vector.load %arg1[%c4_37, %c28] : memref<24x38xf32, #tpu.memory_space<vmem>>, vector<4x4xf32>
    %cst_38 = arith.constant dense<0.000000e+00> : vector<4x512xf32>
    %80 = tpu.matmul %79, %78, %cst_38 {dimension_numbers = #tpu.dot_dimension_numbers<[1], [0], [0], [1], [0, 0, 1, 1], [], []>} : vector<4x4xf32>, vector<4x512xf32>, vector<4x512xf32> -> vector<4x512xf32>
    %81 = arith.addf %74, %80 : vector<4x512xf32>
    %c495_i32 = arith.constant 495 : i32
    %82 = tpu.dynamic_rotate %28 by %c495_i32 dim 1 : vector<4x512xf32>, i32 -> vector<4x512xf32>
    %c8_39 = arith.constant 8 : index
    %c0_40 = arith.constant 0 : index
    %83 = vector.load %arg2[%c8_39, %c0_40] : memref<9x512xf32, #tpu.memory_space<vmem>>, vector<1x512xf32>
    %84 = vector.broadcast %83 : vector<1x512xf32> to vector<4x512xf32>
    %85 = arith.mulf %82, %84 : vector<4x512xf32>
    %c4_41 = arith.constant 4 : index
    %c32 = arith.constant 32 : index
    %86 = vector.load %arg1[%c4_41, %c32] : memref<24x38xf32, #tpu.memory_space<vmem>>, vector<4x4xf32>
    %cst_42 = arith.constant dense<0.000000e+00> : vector<4x512xf32>
    %87 = tpu.matmul %86, %85, %cst_42 {dimension_numbers = #tpu.dot_dimension_numbers<[1], [0], [0], [1], [0, 0, 1, 1], [], []>} : vector<4x4xf32>, vector<4x512xf32>, vector<4x512xf32> -> vector<4x512xf32>
    %88 = arith.addf %81, %87 : vector<4x512xf32>
    %c4_43 = arith.constant 4 : index
    %c36_44 = arith.constant 36 : index
    %89 = vector.load %arg1[%c4_43, %c36_44] : memref<24x38xf32, #tpu.memory_space<vmem>>, vector<4x1xf32>
    %c4_45 = arith.constant 4 : index
    %c37_46 = arith.constant 37 : index
    %90 = vector.load %arg1[%c4_45, %c37_46] : memref<24x38xf32, #tpu.memory_space<vmem>>, vector<4x1xf32>
    %cst_47 = arith.constant dense<0.000000e+00> : vector<4x1xf32>
    %91 = tpu.matmul %88, %1, %cst_47 {dimension_numbers = #tpu.dot_dimension_numbers<[1], [0], [0], [1], [0, 0, 1, 1], [], []>} : vector<4x512xf32>, vector<512x1xf32>, vector<4x1xf32> -> vector<4x1xf32>
    %92 = arith.mulf %88, %88 : vector<4x512xf32>
    %cst_48 = arith.constant dense<0.000000e+00> : vector<4x1xf32>
    %93 = tpu.matmul %92, %1, %cst_48 {dimension_numbers = #tpu.dot_dimension_numbers<[1], [0], [0], [1], [0, 0, 1, 1], [], []>} : vector<4x512xf32>, vector<512x1xf32>, vector<4x1xf32> -> vector<4x1xf32>
    %cst_49 = arith.constant 0.001953125 : f32
    %94 = vector.broadcast %cst_49 : f32 to vector<4x1xf32>
    %95 = arith.mulf %91, %94 : vector<4x1xf32>
    %cst_50 = arith.constant 0.001953125 : f32
    %96 = vector.broadcast %cst_50 : f32 to vector<4x1xf32>
    %97 = arith.mulf %93, %96 : vector<4x1xf32>
    %98 = arith.mulf %95, %95 : vector<4x1xf32>
    %99 = arith.subf %97, %98 : vector<4x1xf32>
    %cst_51 = arith.constant 0.000000e+00 : f32
    %100 = vector.broadcast %cst_51 : f32 to vector<4x1xf32>
    %101 = arith.maximumf %99, %100 : vector<4x1xf32>
    %cst_52 = arith.constant 9.99999974E-6 : f32
    %102 = vector.broadcast %cst_52 : f32 to vector<4x1xf32>
    %103 = arith.addf %101, %102 : vector<4x1xf32>
    %104 = math.rsqrt %103 : vector<4x1xf32>
    %105 = arith.mulf %89, %104 : vector<4x1xf32>
    %106 = arith.mulf %95, %105 : vector<4x1xf32>
    %107 = arith.subf %90, %106 : vector<4x1xf32>
    %108 = vector.broadcast %105 : vector<4x1xf32> to vector<4x512xf32>
    %109 = arith.mulf %88, %108 : vector<4x512xf32>
    %110 = vector.broadcast %107 : vector<4x1xf32> to vector<4x512xf32>
    %111 = arith.addf %109, %110 : vector<4x512xf32>
    %cst_53 = arith.constant 0.000000e+00 : f32
    %112 = vector.broadcast %cst_53 : f32 to vector<4x512xf32>
    %113 = arith.maximumf %111, %112 : vector<4x512xf32>
    %c8_54 = arith.constant 8 : index
    %c0_55 = arith.constant 0 : index
    %114 = vector.load %arg1[%c8_54, %c0_55] : memref<24x38xf32, #tpu.memory_space<vmem>>, vector<16x4xf32>
    %cst_56 = arith.constant dense<0.000000e+00> : vector<16x512xf32>
    %115 = tpu.matmul %114, %113, %cst_56 {dimension_numbers = #tpu.dot_dimension_numbers<[1], [0], [0], [1], [0, 0, 1, 1], [], []>} : vector<16x4xf32>, vector<4x512xf32>, vector<16x512xf32> -> vector<16x512xf32>
    %c8_57 = arith.constant 8 : index
    %c36_58 = arith.constant 36 : index
    %116 = vector.load %arg1[%c8_57, %c36_58] : memref<24x38xf32, #tpu.memory_space<vmem>>, vector<16x1xf32>
    %c8_59 = arith.constant 8 : index
    %c37_60 = arith.constant 37 : index
    %117 = vector.load %arg1[%c8_59, %c37_60] : memref<24x38xf32, #tpu.memory_space<vmem>>, vector<16x1xf32>
    %cst_61 = arith.constant dense<0.000000e+00> : vector<16x1xf32>
    %118 = tpu.matmul %115, %1, %cst_61 {dimension_numbers = #tpu.dot_dimension_numbers<[1], [0], [0], [1], [0, 0, 1, 1], [], []>} : vector<16x512xf32>, vector<512x1xf32>, vector<16x1xf32> -> vector<16x1xf32>
    %119 = arith.mulf %115, %115 : vector<16x512xf32>
    %cst_62 = arith.constant dense<0.000000e+00> : vector<16x1xf32>
    %120 = tpu.matmul %119, %1, %cst_62 {dimension_numbers = #tpu.dot_dimension_numbers<[1], [0], [0], [1], [0, 0, 1, 1], [], []>} : vector<16x512xf32>, vector<512x1xf32>, vector<16x1xf32> -> vector<16x1xf32>
    %cst_63 = arith.constant 0.001953125 : f32
    %121 = vector.broadcast %cst_63 : f32 to vector<16x1xf32>
    %122 = arith.mulf %118, %121 : vector<16x1xf32>
    %cst_64 = arith.constant 0.001953125 : f32
    %123 = vector.broadcast %cst_64 : f32 to vector<16x1xf32>
    %124 = arith.mulf %120, %123 : vector<16x1xf32>
    %125 = arith.mulf %122, %122 : vector<16x1xf32>
    %126 = arith.subf %124, %125 : vector<16x1xf32>
    %cst_65 = arith.constant 0.000000e+00 : f32
    %127 = vector.broadcast %cst_65 : f32 to vector<16x1xf32>
    %128 = arith.maximumf %126, %127 : vector<16x1xf32>
    %cst_66 = arith.constant 9.99999974E-6 : f32
    %129 = vector.broadcast %cst_66 : f32 to vector<16x1xf32>
    %130 = arith.addf %128, %129 : vector<16x1xf32>
    %131 = math.rsqrt %130 : vector<16x1xf32>
    %132 = arith.mulf %116, %131 : vector<16x1xf32>
    %133 = arith.mulf %122, %132 : vector<16x1xf32>
    %134 = arith.subf %117, %133 : vector<16x1xf32>
    %135 = vector.broadcast %132 : vector<16x1xf32> to vector<16x512xf32>
    %136 = arith.mulf %115, %135 : vector<16x512xf32>
    %137 = vector.broadcast %134 : vector<16x1xf32> to vector<16x512xf32>
    %138 = arith.addf %136, %137 : vector<16x512xf32>
    %139 = arith.addf %138, %0 : vector<16x512xf32>
    %cst_67 = arith.constant 0.000000e+00 : f32
    %140 = vector.broadcast %cst_67 : f32 to vector<16x512xf32>
    %141 = arith.maximumf %139, %140 : vector<16x512xf32>
    %c0_68 = arith.constant 0 : index
    %c0_69 = arith.constant 0 : index
    %142 = vector.load %arg3[%c0_68, %c0_69] : memref<16x512xf32, #tpu.memory_space<vmem>>, vector<16x512xf32>
    tpu.vector_store %arg3[%c0_68, %c0_69], %141 {strides = array<i32>} : memref<16x512xf32, #tpu.memory_space<vmem>>, vector<16x512xf32>,
    return
  }
}

</mosaic_0001>

<bundles_post_ra>
// kernel: bottleneck.1
= control target key start
LH: loop header
LB: loop body
LE: loop exit
PB: predicated region body
PF: predicated region fallthrough
CT: control target
= control target key end

     0   :  { %vm23_vm0 = vcmask 130048   ;;  %v2225_v9 = vmov 1.0   ;;  %s2226_s30 = smov 36   ;;  %s2227_s4 = smov 92   ;;  %v2228_v47 = vmov 36   ;;  %v2234_v51 = vmov 37   ;;  %s3188_s0 = inlined_call_operand.vmem [shape: f32[16,512], index: 0, kind: input, shape index: {}, may-alias: {0,3}]   ;;  %s3189_s1 = inlined_call_operand.vmem [shape: f32[24,38], index: 1, kind: input, shape index: {}]   ;;  %s3190_s2 = inlined_call_operand.vmem [shape: f32[9,512], index: 2, kind: input, shape index: {}]   ;;  %s3191_s3 = inlined_call_operand.vmem [shape: f32[16,512], index: 3, kind: output, shape index: {}, may-alias: {0,3}]  }
   0x1   :  { %v20_v0 = vld [vmem:[%s3188_s0 + $0x30] sm:$0xff]  ;;  %v21_v1 = vld [vmem:[%s3188_s0 + $0x38] sm:$0xff]  ;;  %v2281_v4 = vld [vmem:[%s3189_s1] sm:$0xf]  ;;  %2202 = vset.pattern.permute.xlu1 %v2228_v47  ;;  %2204 = vset.pattern.permute.xlu0 %v2228_v47  ;;  %s2229_s7 = smov 112   ;;  %s2230_s8 = smov 37  }
   0x2   :  { %v16_v2 = vld [vmem:[%s3188_s0 + $0x10] sm:$0xff]  ;;  %81 = vmatpush.msra.mxu2 %v20_v0  ;;  %101 = vmatpush.msra.mxu3 %v21_v1  ;;  %v17_v3 = vld [vmem:[%s3188_s0 + $0x18] sm:$0xff]  ;;  %v18_v5 = vld [vmem:[%s3188_s0 + $0x20] sm:$0xff]  ;;  %s2231_s9 = smov 104   ;;  %s2232_s10 = smov 116   ;;  %vm387_vm5 = vcmask 1043456  }
   0x3   :  { %v19_v6 = vld [vmem:[%s3188_s0 + $0x28] sm:$0xff]  ;;  %v14_v7 = vld [vmem:[%s3188_s0] sm:$0xff]  ;;  %41 = vmatpush.msra.mxu0 %v18_v5  ;;  %s2233_s11 = smov 108   ;;  %2203 = vset.pattern.permute.xlu2 %v2234_v51  ;;  %s2235_s12 = smov 124   ;;  %vm384_vm6 = vcmask 31744  }
   0x4   :  { %82 = vmatpush.msra.mxu2 %v16_v2  ;;  %102 = vmatpush.msra.mxu3 %v17_v3  ;;  %v15_v8 = vld [vmem:[%s3188_s0 + $0x8] sm:$0xff]  ;;  %v2459_v48 = vld [vmem:[%s3189_s1 + $0x4] sm:$0xf]  ;;  %s2236_s13 = smov 120   ;;  %s2237_s14 = smov 16  }
   0x5   :  { %2088 = vmatmul.msk.f32.vlgmr.msra.gmra.mxu2 %vm23_vm0, %v2281_v4  ;;  %2089 = vmatmul.msk.f32.vlgmr.msra.gmra.mxu3 %vm23_vm0, %v2281_v4  ;;  %s2238_s15 = smov 17   ;;  %s2239_s16 = smov 15  }
   0x6   :  { %61 = vmatpush.msra.mxu1 %v19_v6  ;;  %147 = vmatpush.msrb.mxu2 %v2225_v9  ;;  %s2240_s17 = smov 1   ;;  %s2241_s18 = smov 127  }
   0x7   :  { %167 = vmatpush.msrb.mxu3 %v2225_v9  ;;  %42 = vmatpush.msra.mxu0 %v14_v7  ;;  %s2242_s19 = smov 113   ;;  %s2243_s20 = smov 111  }
   0x8   :  { %62 = vmatpush.msra.mxu1 %v15_v8  ;;  %2086 = vmatmul.msk.f32.vlgmr.msra.gmra.mxu0 %vm23_vm0, %v2281_v4  ;;  %s2244_s21 = smov 100   ;;  %s2245_s22 = smov 96  }
   0x9   :  { %2087 = vmatmul.msk.f32.vlgmr.msra.gmra.mxu1 %vm23_vm0, %v2281_v4  ;;  %107 = vmatpush.msrb.mxu0 %v2225_v9 }
   0xa   :  { %127 = vmatpush.msrb.mxu1 %v2225_v9  ;;  %148 = vmatpush.msrb.mxu2 %v2225_v9 }
   0xb   :  { %168 = vmatpush.msrb.mxu3 %v2225_v9  ;;  %108 = vmatpush.msrb.mxu0 %v2225_v9 }
   0xc   :  { %128 = vmatpush.msrb.mxu1 %v2225_v9  ;;  %149 = vmatpush.msrb.mxu2 %v2225_v9 }
   0xd   :  { %169 = vmatpush.msrb.mxu3 %v2225_v9  ;;  %109 = vmatpush.msrb.mxu0 %v2225_v9 }
   0xe   :  { %129 = vmatpush.msrb.mxu1 %v2225_v9  ;;  %150 = vmatpush.msrb.mxu2 %v2225_v9 }
   0xf   :  { %170 = vmatpush.msrb.mxu3 %v2225_v9  ;;  %110 = vmatpush.msrb.mxu0 %v2225_v9 }
  0x10   :  { %130 = vmatpush.msrb.mxu1 %v2225_v9  ;;  %151 = vmatpush.msrb.mxu2 %v2225_v9 }
  0x11   :  { %171 = vmatpush.msrb.mxu3 %v2225_v9  ;;  %111 = vmatpush.msrb.mxu0 %v2225_v9 }
  0x12   :  { %131 = vmatpush.msrb.mxu1 %v2225_v9  ;;  %152 = vmatpush.msrb.mxu2 %v2225_v9 }
  0x13   :  { %172 = vmatpush.msrb.mxu3 %v2225_v9  ;;  %112 = vmatpush.msrb.mxu0 %v2225_v9 }
  0x14   :  { %132 = vmatpush.msrb.mxu1 %v2225_v9  ;;  %153 = vmatpush.msrb.mxu2 %v2225_v9 }
  0x15   :  { %173 = vmatpush.msrb.mxu3 %v2225_v9  ;;  %113 = vmatpush.msrb.mxu0 %v2225_v9 }
  0x16   :  { %133 = vmatpush.msrb.mxu1 %v2225_v9  ;;  %154 = vmatpush.msrb.mxu2 %v2225_v9 }
  0x17   :  { %174 = vmatpush.msrb.mxu3 %v2225_v9  ;;  %114 = vmatpush.msrb.mxu0 %v2225_v9 }
  0x18   :  { %134 = vmatpush.msrb.mxu1 %v2225_v9  ;;  %155 = vmatpush.msrb.mxu2 %v2225_v9 }
  0x19   :  { %175 = vmatpush.msrb.mxu3 %v2225_v9  ;;  %115 = vmatpush.msrb.mxu0 %v2225_v9 }
  0x1a   :  { %135 = vmatpush.msrb.mxu1 %v2225_v9  ;;  %156 = vmatpush.msrb.mxu2 %v2225_v9 }
  0x1b   :  { %176 = vmatpush.msrb.mxu3 %v2225_v9  ;;  %116 = vmatpush.msrb.mxu0 %v2225_v9 }
  0x1c   :  { %136 = vmatpush.msrb.mxu1 %v2225_v9  ;;  %157 = vmatpush.msrb.mxu2 %v2225_v9 }
  0x1d   :  { %177 = vmatpush.msrb.mxu3 %v2225_v9  ;;  %117 = vmatpush.msrb.mxu0 %v2225_v9 }
  0x1e   :  { %137 = vmatpush.msrb.mxu1 %v2225_v9  ;;  %158 = vmatpush.msrb.mxu2 %v2225_v9 }
  0x1f   :  { %178 = vmatpush.msrb.mxu3 %v2225_v9  ;;  %118 = vmatpush.msrb.mxu0 %v2225_v9 }
  0x20   :  { %138 = vmatpush.msrb.mxu1 %v2225_v9  ;;  %159 = vmatpush.msrb.mxu2 %v2225_v9 }
  0x21   :  { %179 = vmatpush.msrb.mxu3 %v2225_v9  ;;  %119 = vmatpush.msrb.mxu0 %v2225_v9 }
  0x22   :  { %139 = vmatpush.msrb.mxu1 %v2225_v9  ;;  %160 = vmatpush.msrb.mxu2 %v2225_v9 }
  0x23   :  { %180 = vmatpush.msrb.mxu3 %v2225_v9  ;;  %120 = vmatpush.msrb.mxu0 %v2225_v9 }
  0x24   :  { %140 = vmatpush.msrb.mxu1 %v2225_v9  ;;  %161 = vmatpush.msrb.mxu2 %v2225_v9 }
  0x25   :  { %181 = vmatpush.msrb.mxu3 %v2225_v9  ;;  %121 = vmatpush.msrb.mxu0 %v2225_v9 }
  0x26   :  { %141 = vmatpush.msrb.mxu1 %v2225_v9  ;;  %162 = vmatpush.msrb.mxu2 %v2225_v9 }
  0x27   :  { %182 = vmatpush.msrb.mxu3 %v2225_v9  ;;  %122 = vmatpush.msrb.mxu0 %v2225_v9 }
  0x28   :  { %142 = vmatpush.msrb.mxu1 %v2225_v9  ;;  %231 = vmatpush.msra.mxu2 %v2225_v9 }
  0x29   :  { %191 = vmatpush.msra.mxu0 %v2225_v9  ;;  %251 = vmatpush.msra.mxu3 %v2225_v9 }
  0x2a   :  { %211 = vmatpush.msra.mxu1 %v2225_v9  ;;  %232 = vmatpush.msra.mxu2 %v2225_v9 }
  0x2b   :  { %192 = vmatpush.msra.mxu0 %v2225_v9  ;;  %252 = vmatpush.msra.mxu3 %v2225_v9 }
  0x2c   :  { %212 = vmatpush.msra.mxu1 %v2225_v9  ;;  %233 = vmatpush.msra.mxu2 %v2225_v9 }
  0x2d   :  { %193 = vmatpush.msra.mxu0 %v2225_v9  ;;  %253 = vmatpush.msra.mxu3 %v2225_v9 }
  0x2e   :  { %213 = vmatpush.msra.mxu1 %v2225_v9  ;;  %234 = vmatpush.msra.mxu2 %v2225_v9 }
  0x2f   :  { %194 = vmatpush.msra.mxu0 %v2225_v9  ;;  %254 = vmatpush.msra.mxu3 %v2225_v9 }
  0x30   :  { %214 = vmatpush.msra.mxu1 %v2225_v9  ;;  %235 = vmatpush.msra.mxu2 %v2225_v9 }
  0x31   :  { %195 = vmatpush.msra.mxu0 %v2225_v9  ;;  %255 = vmatpush.msra.mxu3 %v2225_v9 }
  0x32   :  { %215 = vmatpush.msra.mxu1 %v2225_v9  ;;  %236 = vmatpush.msra.mxu2 %v2225_v9 }
  0x33   :  { %196 = vmatpush.msra.mxu0 %v2225_v9  ;;  %256 = vmatpush.msra.mxu3 %v2225_v9 }
  0x34   :  { %216 = vmatpush.msra.mxu1 %v2225_v9  ;;  %237 = vmatpush.msra.mxu2 %v2225_v9 }
  0x35   :  { %197 = vmatpush.msra.mxu0 %v2225_v9  ;;  %257 = vmatpush.msra.mxu3 %v2225_v9 }
  0x36   :  { %217 = vmatpush.msra.mxu1 %v2225_v9  ;;  %238 = vmatpush.msra.mxu2 %v2225_v9 }
  0x37   :  { %198 = vmatpush.msra.mxu0 %v2225_v9  ;;  %258 = vmatpush.msra.mxu3 %v2225_v9 }
  0x38   :  { %218 = vmatpush.msra.mxu1 %v2225_v9  ;;  %239 = vmatpush.msra.mxu2 %v2225_v9 }
  0x39   :  { %199 = vmatpush.msra.mxu0 %v2225_v9  ;;  %259 = vmatpush.msra.mxu3 %v2225_v9 }
  0x3a   :  { %219 = vmatpush.msra.mxu1 %v2225_v9  ;;  %240 = vmatpush.msra.mxu2 %v2225_v9 }
  0x3b   :  { %200 = vmatpush.msra.mxu0 %v2225_v9  ;;  %260 = vmatpush.msra.mxu3 %v2225_v9 }
  0x3c   :  { %220 = vmatpush.msra.mxu1 %v2225_v9  ;;  %241 = vmatpush.msra.mxu2 %v2225_v9 }
  0x3d   :  { %201 = vmatpush.msra.mxu0 %v2225_v9  ;;  %261 = vmatpush.msra.mxu3 %v2225_v9 }
  0x3e   :  { %221 = vmatpush.msra.mxu1 %v2225_v9  ;;  %242 = vmatpush.msra.mxu2 %v2225_v9 }
  0x3f   :  { %202 = vmatpush.msra.mxu0 %v2225_v9  ;;  %262 = vmatpush.msra.mxu3 %v2225_v9 }
  0x40   :  { %222 = vmatpush.msra.mxu1 %v2225_v9  ;;  %243 = vmatpush.msra.mxu2 %v2225_v9 }
  0x41   :  { %203 = vmatpush.msra.mxu0 %v2225_v9  ;;  %263 = vmatpush.msra.mxu3 %v2225_v9 }
  0x42   :  { %223 = vmatpush.msra.mxu1 %v2225_v9  ;;  %244 = vmatpush.msra.mxu2 %v2225_v9 }
  0x43   :  { %204 = vmatpush.msra.mxu0 %v2225_v9  ;;  %264 = vmatpush.msra.mxu3 %v2225_v9 }
  0x44   :  { %224 = vmatpush.msra.mxu1 %v2225_v9  ;;  %245 = vmatpush.msra.mxu2 %v2225_v9 }
  0x45   :  { %205 = vmatpush.msra.mxu0 %v2225_v9  ;;  %265 = vmatpush.msra.mxu3 %v2225_v9 }
  0x46   :  { %225 = vmatpush.msra.mxu1 %v2225_v9  ;;  %246 = vmatpush.msra.mxu2 %v2225_v9 }
  0x47   :  { %206 = vmatpush.msra.mxu0 %v2225_v9  ;;  %266 = vmatpush.msra.mxu3 %v2225_v9 }
  0x48   :  { %226 = vmatpush.msra.mxu1 %v2225_v9 }
  0x85   :  { %v2431_v10 = vpop.f32.mrf.mxu0 }
  0x86   :  { %v2433_v11 = vpop.f32.mrf.mxu1  ;;  %123 = vmatmul.f32.vlgmr.msrb.gmra.mxu0 %v2431_v10  ;;  %v187_v14 = vmul.f32 %v2431_v10, %v2431_v10 }
  0x87   :  { %143 = vmatmul.f32.vlgmr.msrb.gmra.mxu1 %v2433_v11  ;;  %v188_v15 = vmul.f32 %v2433_v11, %v2433_v11 }
  0x88   :  { %v2437_v12 = vpop.f32.mrf.mxu2  ;;  %v2439_v13 = vpop.f32.mrf.mxu3 }
  0x89   :  { %163 = vmatmul.f32.vlgmr.msrb.gmra.mxu2 %v2437_v12  ;;  %183 = vmatmul.f32.vlgmr.msrb.gmra.mxu3 %v2439_v13  ;;  %v189_v16 = vmul.f32 %v2437_v12, %v2437_v12  ;;  %v190_v17 = vmul.f32 %v2439_v13, %v2439_v13 }
  0x8e   :  { %207 = vmatmul.f32.vlgmr.msra.gmra.mxu0 %v187_v14 }
  0x8f   :  { %227 = vmatmul.f32.vlgmr.msra.gmra.mxu1 %v188_v15 }
  0x91   :  { %247 = vmatmul.f32.vlgmr.msra.gmra.mxu2 %v189_v16  ;;  %267 = vmatmul.f32.vlgmr.msra.gmra.mxu3 %v190_v17  ;;  %v2090_v16 = vld [vmem:[%s3190_s2 + $0x1] ss:$8 sm:$0xf] }
  0x92   :  { %v371_v17 = vperm.slane %v2090_v16, 2 }
 0x103   :  { %v124_v18 = vpop.f32.mrf.mxu0 }
 0x104   :  { %v144_v19 = vpop.f32.mrf.mxu1 }
 0x105   :  { %v145_v20 = vadd.f32 %v144_v19, %v124_v18  ;;  %v372_v18 = vperm.slane %v2090_v16, 3 }
 0x10b   :  { %v208_v24 = vpop.f32.mrf.mxu0 }
 0x10c   :  { %v164_v21 = vpop.f32.mrf.mxu2  ;;  %v184_v22 = vpop.f32.mrf.mxu3 }
 0x10d   :  { %v165_v23 = vadd.f32 %v164_v21, %v145_v20  ;;  %v228_v25 = vpop.f32.mrf.mxu1 }
 0x10e   :  { %v229_v27 = vadd.f32 %v228_v25, %v208_v24 }
 0x10f   :  { %v185_v26 = vadd.f32 %v184_v22, %v165_v23 }
 0x111   :  { %v271_v29 = vmul.f32 0.001953125, %v185_v26  ;;  %v338_v26 = vld [vmem:[%s3190_s2] ss:$8 sm:$0xf] }
 0x113   :  { %v273_v33 = vmul.f32 %v271_v29, %v271_v29 }
 0x114   :  { %v248_v28 = vpop.f32.mrf.mxu2  ;;  %v268_v31 = vpop.f32.mrf.mxu3 }
 0x115   :  { %v249_v30 = vadd.f32 %v248_v28, %v229_v27  ;;  %v343_v27 = vperm.slane %v338_v26, 3  ;;  %v342_v28 = vperm.slane %v338_v26, 2 }
 0x117   :  { %v269_v32 = vadd.f32 %v268_v31, %v249_v30 }
 0x119   :  { %v272_v34 = vmul.f32 0.001953125, %v269_v32 }
 0x11b   :  { %v274_v35 = vsub.f32 %v272_v34, %v273_v33 }
 0x11d   :  { %v275_v36 = vmax.f32 %v274_v35, 0.0 }
 0x11f   :  { %v276_v37 = vadd.f32 1e-05, %v275_v36  ;;  %v2107_v36 = vld [vmem:[%s3190_s2 + $0x2] ss:$8 sm:$0xf] }
 0x121   :  { %2208 = vrsqrt.f32 %v276_v37  ;;  %vm283_vm2 = vweird.f32 %v276_v37 }
 0x127   :  { %v2209_v38 = vpop.eup %2208 }
 0x128   :  { %v278_v39 = vmul.f32 %v2209_v38, %v276_v37  ;;  %vm284_vm1 = vweird.f32 %v2209_v38  ;;  %v592_v37 = vperm.slane %v2107_v36, 2 }
 0x129   :  { %vm285_vm3 = vmor %vm283_vm2, %vm284_vm1 }
 0x12a   :  { %v279_v40 = vmul.f32 %v2209_v38, %v278_v39  ;;  %v370_v39 = vperm.slane %v2090_v16, 1 }
 0x12c   :  { %v280_v41 = vmul.f32 0.5, %v279_v40 }
 0x12e   :  { %v281_v42 = vsub.f32 1.5, %v280_v41 }
 0x130   :  { %v282_v43 = vmul.f32 %v2209_v38, %v281_v42 }
 0x132   :  { %v286_v44 = vsel %vm285_vm3, %v2209_v38, %v282_v43  ;;  %v369_v38 = vperm.slane %v2090_v16, 0 }
 0x133   :  { %288 = vrot.lane.b32.xlu0 %v286_v44, %s2226_s30 }
 0x1a5   :  { %v289_v45 = vpop.permute.xlu0 %288 }
 0x1a6   :  { %v291_v46 = vmul.f32 %v289_v45, %v2281_v4 }
 0x1a8   :  { %293 = vrot.lane.b32.xlu0 %v291_v46, %s2227_s4 }
 0x1b0   :  { %830 = vrot.lane.b32.xlu0 %v2459_v48, %s2229_s7 }
 0x1b8   :  { %1086 = vrot.lane.b32.xlu0 %v2459_v48, %s2231_s9 }
 0x21a   :  { %v294_v49 = vpop.permute.xlu0 %293 }
 0x21b   :  { %v296_v50 = vmul.f32 %v294_v49, %v271_v29 }
 0x21d   :  { %298 = vrot.lane.b32.xlu1 %v296_v50, %s2230_s8 }
 0x222   :  { %v2528_v8 = vpop.permute.xlu0 %830 }
 0x225   :  { %303 = vperm.xlu1 %2202, %v291_v46  }
 0x22d   :  { %730 = vrot.lane.b32.xlu1 %v2459_v48, %s2232_s10 }
 0x22e   :  { %2205 = vset.pattern.permute.xlu1 %v2234_v51 }
 0x235   :  { %958 = vrot.lane.b32.xlu1 %v2459_v48, %s2233_s11 }
 0x28f   :  { %v299_v52 = vpop.permute.xlu1 %298 }
 0x290   :  { %v301_v53 = vsub.f32 %v2281_v4, %v299_v52  ;;  %v590_v52 = vperm.slane %v2107_v36, 0 }
 0x292   :  { %312 = vperm.xlu2 %2203, %v301_v53   ;;  %v593_v53 = vperm.slane %v2107_v36, 3 }
 0x297   :  { %v304_v54 = vpop.permute.xlu1 %303 }
 0x298   :  { %v307_v55 = vmul.f32 %v304_v54, %v2433_v11  ;;  %v308_v56 = vmul.f32 %v304_v54, %v2437_v12  ;;  %v309_v57 = vmul.f32 %v304_v54, %v2439_v13  ;;  %v306_v1 = vmul.f32 %v304_v54, %v2431_v10  ;;  %v2534_v12 = vpop.permute.xlu0 %1086 }
 0x299   :  { %v331_v13 = vlaneseq  ;;  %v340_v54 = vperm.slane %v338_v26, 0 }
 0x29a   :  { %382 = vrot.lane.b32.xlu2 %v2459_v48, %s2235_s12 }
 0x29b   :  { %v2538_v15 = vand.u32 127, %v331_v13 }
 0x29d   :  { %vm361_vm4 = vcmp.lt.s32.totalorder %v2538_v15, 16  ;;  %vm333_vm7 = vcmp.lt.s32.totalorder %v2538_v15, 17  ;;  %vm582_vm8 = vcmp.lt.s32.totalorder %v2538_v15, 15  ;;  %vm710_vm9 = vcmp.lt.s32.totalorder %v2538_v15, 1 }
 0x29e   :  { %vm938_vm10 = vcmp.lt.s32.totalorder %v2538_v15, 127  ;;  %vm1194_vm11 = vcmp.lt.s32.totalorder %v2538_v15, 112  ;;  %vm1066_vm12 = vcmp.lt.s32.totalorder %v2538_v15, 113  ;;  %vm1322_vm13 = vcmp.lt.s32.totalorder %v2538_v15, 111 }
 0x29f   :  { %v2526_v7 = vpop.permute.xlu1 %730 }
 0x2a2   :  { %602 = vrot.lane.b32.xlu2 %v2459_v48, %s2236_s13 }
 0x2a7   :  { %v2532_v11 = vpop.permute.xlu1 %958 }
 0x2ec   :  { %v313_v58 = vpop.permute.xlu2 %312 }
 0x2ed   :  { %v316_v59 = vadd.f32 %v313_v58, %v307_v55  ;;  %v317_v60 = vadd.f32 %v313_v58, %v308_v56  ;;  %v318_v61 = vadd.f32 %v313_v58, %v309_v57  ;;  %v315_v2 = vadd.f32 %v313_v58, %v306_v1 }
 0x2ee   :  { %v341_v55 = vperm.slane %v338_v26, 1  ;;  %v591_v56 = vperm.slane %v2107_v36, 1  ;;  %v2133_v26 = vld [vmem:[%s3190_s2 + $0x5] ss:$8 sm:$0xf] }
 0x2ef   :  { %v2475_v62 = vmax.f32 %v316_v59, 0.0  ;;  %v2477_v63 = vmax.f32 %v317_v60, 0.0  ;;  %v2479_v0 = vmax.f32 %v318_v61, 0.0  ;;  %v2488_v3 = vmax.f32 %v315_v2, 0.0 }
 0x2f1   :  { %359 = vrot.lane.b32.xlu1 %v2479_v0, %s2237_s14  ;;  %357 = vrot.lane.b32.xlu0 %v2477_v63, %s2237_s14 }
 0x2f2   :  { %355 = vrot.lane.b32.xlu2 %v2475_v62, %s2237_s14 }
 0x2f4   :  { %v2514_v4 = vpop.permute.xlu2 %382 }
 0x2f9   :  { %327 = vrot.lane.b32.xlu1 %v2477_v63, %s2238_s15  ;;  %325 = vrot.lane.b32.xlu0 %v2475_v62, %s2238_s15 }
 0x2fa   :  { %329 = vrot.lane.b32.xlu2 %v2479_v0, %s2238_s15 }
 0x2fc   :  { %v2523_v5 = vpop.permute.xlu2 %602 }
 0x301   :  { %576 = vrot.lane.b32.xlu1 %v2475_v62, %s2239_s16  ;;  %353 = vrot.lane.b32.xlu0 %v2488_v3, %s2237_s14 }
 0x302   :  { %578 = vrot.lane.b32.xlu2 %v2477_v63, %s2239_s16 }
 0x309   :  { %580 = vrot.lane.b32.xlu1 %v2479_v0, %s2239_s16  ;;  %323 = vrot.lane.b32.xlu0 %v2488_v3, %s2238_s15 }
 0x30a   :  { %574 = vrot.lane.b32.xlu2 %v2488_v3, %s2239_s16 }
 0x311   :  { %706 = vrot.lane.b32.xlu1 %v2477_v63, %s2240_s17  ;;  %704 = vrot.lane.b32.xlu0 %v2475_v62, %s2240_s17 }
 0x312   :  { %702 = vrot.lane.b32.xlu2 %v2488_v3, %s2240_s17 }
 0x319   :  { %934 = vrot.lane.b32.xlu1 %v2477_v63, %s2241_s18  ;;  %708 = vrot.lane.b32.xlu0 %v2479_v0, %s2240_s17 }
 0x31a   :  { %936 = vrot.lane.b32.xlu2 %v2479_v0, %s2241_s18 }
 0x321   :  { %932 = vrot.lane.b32.xlu1 %v2475_v62, %s2241_s18  ;;  %930 = vrot.lane.b32.xlu0 %v2488_v3, %s2241_s18 }
 0x322   :  { %1062 = vrot.lane.b32.xlu2 %v2477_v63, %s2242_s19 }
 0x329   :  { %1190 = vrot.lane.b32.xlu1 %v2477_v63, %s2229_s7  ;;  %1064 = vrot.lane.b32.xlu0 %v2479_v0, %s2242_s19 }
 0x32a   :  { %1058 = vrot.lane.b32.xlu2 %v2488_v3, %s2242_s19 }
 0x331   :  { %1186 = vrot.lane.b32.xlu1 %v2488_v3, %s2229_s7  ;;  %1060 = vrot.lane.b32.xlu0 %v2475_v62, %s2242_s19 }
 0x332   :  { %1192 = vrot.lane.b32.xlu2 %v2479_v0, %s2229_s7 }
 0x339   :  { %1320 = vrot.lane.b32.xlu1 %v2479_v0, %s2243_s20  ;;  %1318 = vrot.lane.b32.xlu0 %v2477_v63, %s2243_s20 }
 0x33a   :  { %1214 = vrot.lane.b32.xlu2 %v2459_v48, %s2244_s21 }
 0x341   :  { %1342 = vrot.lane.b32.xlu1 %v2459_v48, %s2245_s22  ;;  %1314 = vrot.lane.b32.xlu0 %v2488_v3, %s2243_s20 }
 0x342   :  { %1188 = vrot.lane.b32.xlu2 %v2475_v62, %s2229_s7 }
 0x34a   :  { %1316 = vrot.lane.b32.xlu2 %v2475_v62, %s2243_s20 }
 0x34c   :  { %v356_v6 = vpop.permute.xlu2 %355 }
 0x354   :  { %v2530_v10 = vpop.permute.xlu2 %329 }
 0x35c   :  { %v2536_v14 = vpop.permute.xlu2 %578 }
 0x363   :  { %v360_v19 = vpop.permute.xlu1 %359  ;;  %v358_v20 = vpop.permute.xlu0 %357 }
 0x364   :  { %v575_v21 = vpop.permute.xlu2 %574  ;;  %v362_v22 = vsel %vm361_vm4, %v358_v20, %v360_v19  ;;  %v363_v23 = vsel %vm361_vm4, %v356_v6, %v358_v20 }
 0x365   :  { %v379_v24 = vmul.f32 %v371_v17, %v363_v23  ;;  %v380_v25 = vmul.f32 %v372_v18, %v362_v22  ;;  %v2116_v18 = vld [vmem:[%s3190_s2 + $0x3] ss:$8 sm:$0xf] }
 0x367   :  { %2095 = vmatpush.msk.msrb.mxu2 %vm387_vm5, %v379_v24  ;;  %2097 = vmatpush.msk.msrb.mxu3 %vm387_vm5, %v380_v25 }
 0x368   :  { %2096 = vmatmul.msk.f32.vlgmr.msrb.gmra.mxu2 %vm384_vm6, %v2514_v4  ;;  %2098 = vmatmul.msk.f32.vlgmr.msrb.gmra.mxu3 %vm384_vm6, %v2514_v4 }
 0x36b   :  { %v328_v29 = vpop.permute.xlu1 %327  ;;  %v326_v30 = vpop.permute.xlu0 %325 }
 0x36c   :  { %v2558_v31 = vpop.permute.xlu2 %702  ;;  %v334_v32 = vsel %vm333_vm7, %v328_v29, %v2530_v10  ;;  %v335_v33 = vsel %vm333_vm7, %v326_v30, %v328_v29  ;;  %v721_v29 = vperm.slane %v2116_v18, 3 }
 0x36d   :  { %v351_v34 = vmul.f32 %v343_v27, %v334_v32  ;;  %v350_v35 = vmul.f32 %v342_v28, %v335_v33  ;;  %v948_v27 = vperm.slane %v2133_v26, 2  ;;  %v718_v28 = vperm.slane %v2116_v18, 0 }
 0x36f   :  { %2103 = vmatpush.msk.msra.mxu2 %vm387_vm5, %v350_v35  ;;  %2105 = vmatpush.msk.msra.mxu3 %vm387_vm5, %v351_v34 }
 0x370   :  { %2104 = vmatmul.msk.f32.vlgmr.msra.gmra.mxu2 %vm384_vm6, %v2459_v48  ;;  %2106 = vmatmul.msk.f32.vlgmr.msra.gmra.mxu3 %vm384_vm6, %v2459_v48 }
 0x373   :  { %v577_v40 = vpop.permute.xlu1 %576  ;;  %v354_v41 = vpop.permute.xlu0 %353 }
 0x374   :  { %v2575_v42 = vpop.permute.xlu2 %936  ;;  %v584_v43 = vsel %vm582_vm8, %v577_v40, %v2536_v14  ;;  %v364_v44 = vsel %vm361_vm4, %v354_v41, %v356_v6  ;;  %v365_v45 = vsel %vm361_vm4, %v360_v19, %v354_v41  ;;  %v585_v57 = vsel %vm582_vm8, %v575_v21, %v577_v40 }
 0x375   :  { %v600_v46 = vmul.f32 %v592_v37, %v584_v43  ;;  %v377_v49 = vmul.f32 %v369_v38, %v365_v45  ;;  %v378_v50 = vmul.f32 %v370_v39, %v364_v44  ;;  %v720_v19 = vperm.slane %v2116_v18, 2 }
 0x376   :  { %v949_v38 = vperm.slane %v2133_v26, 3 }
 0x377   :  { %2091 = vmatpush.msk.msrb.mxu0 %vm387_vm5, %v377_v49  ;;  %2093 = vmatpush.msk.msrb.mxu1 %vm387_vm5, %v378_v50  ;;  %v2142_v49 = vld [vmem:[%s3190_s2 + $0x6] ss:$8 sm:$0xf] }
 0x378   :  { %2112 = vmatpush.msk.msrb.mxu2 %vm387_vm5, %v600_v46  ;;  %2092 = vmatmul.msk.f32.vlgmr.msrb.gmra.mxu0 %vm384_vm6, %v2514_v4  ;;  %v1076_v50 = vperm.slane %v2142_v49, 2 }
 0x379   :  { %2094 = vmatmul.msk.f32.vlgmr.msrb.gmra.mxu1 %vm384_vm6, %v2514_v4  ;;  %2113 = vmatmul.msk.f32.vlgmr.msrb.gmra.mxu2 %vm384_vm6, %v2523_v5 }
 0x37b   :  { %v581_v58 = vpop.permute.xlu1 %580  ;;  %v324_v59 = vpop.permute.xlu0 %323 }
 0x37c   :  { %v2595_v60 = vpop.permute.xlu2 %1062  ;;  %v583_v61 = vsel %vm582_vm8, %v2536_v14, %v581_v58  ;;  %v586_v1 = vsel %vm582_vm8, %v581_v58, %v575_v21  ;;  %v336_v2 = vsel %vm333_vm7, %v324_v59, %v326_v30  ;;  %v337_v4 = vsel %vm333_vm7, %v2530_v10, %v324_v59 }
 0x37d   :  { %v598_v6 = vmul.f32 %v590_v52, %v586_v1  ;;  %v601_v13 = vmul.f32 %v593_v53, %v583_v61  ;;  %v348_v16 = vmul.f32 %v340_v54, %v337_v4  ;;  %v349_v17 = vmul.f32 %v341_v55, %v336_v2 }
 0x37e   :  { %v599_v14 = vmul.f32 %v591_v56, %v585_v57  ;;  %v719_v10 = vperm.slane %v2116_v18, 1  ;;  %v1077_v52 = vperm.slane %v2142_v49, 3  ;;  %v1074_v2 = vperm.slane %v2142_v49, 0 }
 0x37f   :  { %2099 = vmatpush.msk.msra.mxu0 %vm387_vm5, %v348_v16  ;;  %2101 = vmatpush.msk.msra.mxu1 %vm387_vm5, %v349_v17  ;;  %v1075_v4 = vperm.slane %v2142_v49, 1 }
 0x380   :  { %2114 = vmatpush.msk.msrb.mxu3 %vm387_vm5, %v601_v13  ;;  %2100 = vmatmul.msk.f32.vlgmr.msra.gmra.mxu0 %vm384_vm6, %v2459_v48 }
 0x381   :  { %2102 = vmatmul.msk.f32.vlgmr.msra.gmra.mxu1 %vm384_vm6, %v2459_v48  ;;  %2108 = vmatpush.msk.msrb.mxu0 %vm387_vm5, %v598_v6 }
 0x382   :  { %2110 = vmatpush.msk.msrb.mxu1 %vm387_vm5, %v599_v14  ;;  %2115 = vmatmul.msk.f32.vlgmr.msrb.gmra.mxu3 %vm384_vm6, %v2523_v5 }
 0x383   :  { %v707_v20 = vpop.permute.xlu1 %706  ;;  %v705_v21 = vpop.permute.xlu0 %704 }
 0x384   :  { %v2622_v22 = vpop.permute.xlu2 %1058  ;;  %v712_v23 = vsel %vm710_vm9, %v705_v21, %v707_v20  ;;  %v713_v48 = vsel %vm710_vm9, %v2558_v31, %v705_v21 }
 0x385   :  { %v727_v24 = vmul.f32 %v719_v10, %v713_v48  ;;  %v728_v25 = vmul.f32 %v720_v19, %v712_v23 }
 0x387   :  { %2119 = vmatpush.msk.msra.mxu1 %vm387_vm5, %v727_v24  ;;  %2121 = vmatpush.msk.msra.mxu2 %vm387_vm5, %v728_v25  ;;  %v2160_v24 = vld [vmem:[%s3190_s2 + $0x20] ss:$8 sm:$0xf] }
 0x388   :  { %2109 = vmatmul.msk.f32.vlgmr.msrb.gmra.mxu0 %vm384_vm6, %v2523_v5  ;;  %2122 = vmatmul.msk.f32.vlgmr.msra.gmra.mxu2 %vm384_vm6, %v2526_v7  ;;  %v1332_v25 = vperm.slane %v2160_v24, 2 }
 0x389   :  { %2111 = vmatmul.msk.f32.vlgmr.msrb.gmra.mxu1 %vm384_vm6, %v2523_v5  ;;  %2129 = vmatpush.msk.msrb.mxu2 %vm387_vm5, %v2477_v63 }
 0x38a   :  { %2127 = vmatpush.msk.msrb.mxu1 %vm387_vm5, %v2475_v62  ;;  %v947_v62 = vperm.slane %v2133_v26, 1 }
 0x38b   :  { %v935_v30 = vpop.permute.xlu1 %934  ;;  %v709_v32 = vpop.permute.xlu0 %708 }
 0x38c   :  { %v2645_v33 = vpop.permute.xlu2 %1192  ;;  %v939_v34 = vsel %vm938_vm10, %v935_v30, %v2575_v42  ;;  %v711_v5 = vsel %vm710_vm9, %v707_v20, %v709_v32  ;;  %v714_v63 = vsel %vm710_vm9, %v709_v32, %v2558_v31  ;;  %v946_v31 = vperm.slane %v2133_v26, 0 }
 0x38d   :  { %v956_v35 = vmul.f32 %v948_v27, %v939_v34  ;;  %v726_v36 = vmul.f32 %v718_v28, %v714_v63  ;;  %v729_v37 = vmul.f32 %v721_v29, %v711_v5  ;;  %v1333_v34 = vperm.slane %v2160_v24, 3 }
 0x38f   :  { %2117 = vmatpush.msk.msra.mxu0 %vm387_vm5, %v726_v36  ;;  %2123 = vmatpush.msk.msra.mxu3 %vm387_vm5, %v729_v37 }
 0x390   :  { %2138 = vmatpush.msk.msra.mxu2 %vm387_vm5, %v956_v35  ;;  %2118 = vmatmul.msk.f32.vlgmr.msra.gmra.mxu0 %vm384_vm6, %v2526_v7 }
 0x391   :  { %2120 = vmatmul.msk.f32.vlgmr.msra.gmra.mxu1 %vm384_vm6, %v2526_v7  ;;  %2124 = vmatmul.msk.f32.vlgmr.msra.gmra.mxu3 %vm384_vm6, %v2526_v7 }
 0x392   :  { %2125 = vmatpush.msk.msrb.mxu0 %vm387_vm5, %v2488_v3  ;;  %2130 = vmatmul.msk.f32.vlgmr.msrb.gmra.mxu2 %vm384_vm6, %v2528_v8 }
 0x393   :  { %2131 = vmatpush.msk.msrb.mxu3 %vm387_vm5, %v2479_v0  ;;  %v933_v39 = vpop.permute.xlu1 %932  ;;  %v931_v40 = vpop.permute.xlu0 %930  ;;  %v2151_v0 = vld [vmem:[%s3190_s2 + $0x7] ss:$8 sm:$0xf] }
 0x394   :  { %v940_v41 = vsel %vm938_vm10, %v933_v39, %v935_v30  ;;  %v941_v7 = vsel %vm938_vm10, %v931_v40, %v933_v39  ;;  %v942_v43 = vsel %vm938_vm10, %v2575_v42, %v931_v40  ;;  %v2677_v46 = vpop.permute.xlu2 %1214  ;;  %v1204_v42 = vperm.slane %v2151_v0, 2 }
 0x395   :  { %v955_v44 = vmul.f32 %v947_v62, %v940_v41  ;;  %v954_v3 = vmul.f32 %v946_v31, %v941_v7  ;;  %v957_v45 = vmul.f32 %v949_v38, %v942_v43  ;;  %v1205_v1 = vperm.slane %v2151_v0, 3 }
 0x396   :  { %v1202_v6 = vperm.slane %v2151_v0, 0  ;;  %v1203_v13 = vperm.slane %v2151_v0, 1 }
 0x397   :  { %2134 = vmatpush.msk.msra.mxu0 %vm387_vm5, %v954_v3  ;;  %2136 = vmatpush.msk.msra.mxu1 %vm387_vm5, %v955_v44 }
 0x398   :  { %2140 = vmatpush.msk.msra.mxu3 %vm387_vm5, %v957_v45  ;;  %2126 = vmatmul.msk.f32.vlgmr.msrb.gmra.mxu0 %vm384_vm6, %v2528_v8 }
 0x399   :  { %2128 = vmatmul.msk.f32.vlgmr.msrb.gmra.mxu1 %vm384_vm6, %v2528_v8  ;;  %2132 = vmatmul.msk.f32.vlgmr.msrb.gmra.mxu3 %vm384_vm6, %v2528_v8 }
 0x39a   :  { %2139 = vmatmul.msk.f32.vlgmr.msra.gmra.mxu2 %vm384_vm6, %v2532_v11 }
 0x39b   :  { %v1191_v53 = vpop.permute.xlu1 %1190  ;;  %v1065_v54 = vpop.permute.xlu0 %1064 }
 0x39c   :  { %v1195_v55 = vsel %vm1194_vm11, %v1191_v53, %v2645_v33  ;;  %v1067_v56 = vsel %vm1066_vm12, %v2595_v60, %v1065_v54  ;;  %v1070_v8 = vsel %vm1066_vm12, %v1065_v54, %v2622_v22  ;;  %v1189_v61 = vpop.permute.xlu2 %1188 }
 0x39d   :  { %v1212_v57 = vmul.f32 %v1204_v42, %v1195_v55  ;;  %v1084_v58 = vmul.f32 %v1076_v50, %v1067_v56  ;;  %v1085_v59 = vmul.f32 %v1077_v52, %v1070_v8  ;;  %v1196_v19 = vsel %vm1194_vm11, %v1189_v61, %v1191_v53 }
 0x39f   :  { %2147 = vmatpush.msk.msrb.mxu2 %vm387_vm5, %v1084_v58  ;;  %2149 = vmatpush.msk.msrb.mxu3 %vm387_vm5, %v1085_v59 }
 0x3a0   :  { %2135 = vmatmul.msk.f32.vlgmr.msra.gmra.mxu0 %vm384_vm6, %v2532_v11 }
 0x3a1   :  { %2156 = vmatpush.msk.msra.mxu2 %vm387_vm5, %v1212_v57  ;;  %2137 = vmatmul.msk.f32.vlgmr.msra.gmra.mxu1 %vm384_vm6, %v2532_v11 }
 0x3a2   :  { %2141 = vmatmul.msk.f32.vlgmr.msra.gmra.mxu3 %vm384_vm6, %v2532_v11  ;;  %2148 = vmatmul.msk.f32.vlgmr.msrb.gmra.mxu2 %vm384_vm6, %v2534_v12 }
 0x3a3   :  { %v1187_v16 = vpop.permute.xlu1 %1186  ;;  %v1061_v17 = vpop.permute.xlu0 %1060 }
 0x3a4   :  { %v1197_v18 = vsel %vm1194_vm11, %v1187_v16, %v1189_v61  ;;  %v1198_v14 = vsel %vm1194_vm11, %v2645_v33, %v1187_v16  ;;  %v1068_v11 = vsel %vm1066_vm12, %v1061_v17, %v2595_v60  ;;  %v1069_v10 = vsel %vm1066_vm12, %v2622_v22, %v1061_v17  ;;  %v1317_v26 = vpop.permute.xlu2 %1316 }
 0x3a5   :  { %v1213_v20 = vmul.f32 %v1205_v1, %v1198_v14  ;;  %v1082_v21 = vmul.f32 %v1074_v2, %v1069_v10  ;;  %v1083_v23 = vmul.f32 %v1075_v4, %v1068_v11  ;;  %v1210_v48 = vmul.f32 %v1202_v6, %v1197_v18 }
 0x3a6   :  { %v1211_v60 = vmul.f32 %v1203_v13, %v1196_v19  ;;  %v1331_v22 = vperm.slane %v2160_v24, 1  ;;  %v1330_v33 = vperm.slane %v2160_v24, 0 }
 0x3a7   :  { %2143 = vmatpush.msk.msrb.mxu0 %vm387_vm5, %v1082_v21  ;;  %2145 = vmatpush.msk.msrb.mxu1 %vm387_vm5, %v1083_v23 }
 0x3a8   :  { %2158 = vmatpush.msk.msra.mxu3 %vm387_vm5, %v1213_v20  ;;  %2144 = vmatmul.msk.f32.vlgmr.msrb.gmra.mxu0 %vm384_vm6, %v2534_v12 }
 0x3a9   :  { %2146 = vmatmul.msk.f32.vlgmr.msrb.gmra.mxu1 %vm384_vm6, %v2534_v12  ;;  %2152 = vmatpush.msk.msra.mxu0 %vm387_vm5, %v1210_v48 }
 0x3aa   :  { %2150 = vmatmul.msk.f32.vlgmr.msrb.gmra.mxu3 %vm384_vm6, %v2534_v12  ;;  %2154 = vmatpush.msk.msra.mxu1 %vm387_vm5, %v1211_v60 }
 0x3ab   :  { %2157 = vmatmul.msk.f32.vlgmr.msra.gmra.mxu2 %vm384_vm6, %v2677_v46  ;;  %v1321_v27 = vpop.permute.xlu1 %1320  ;;  %v1319_v28 = vpop.permute.xlu0 %1318 }
 0x3ac   :  { %v1323_v29 = vsel %vm1322_vm13, %v1319_v28, %v1321_v27  ;;  %v1324_v12 = vsel %vm1322_vm13, %v1317_v26, %v1319_v28 }
 0x3ad   :  { %v1339_v30 = vmul.f32 %v1331_v22, %v1324_v12  ;;  %v1340_v32 = vmul.f32 %v1332_v25, %v1323_v29 }
 0x3af   :  { %2163 = vmatpush.msk.msrb.mxu1 %vm387_vm5, %v1339_v30  ;;  %2165 = vmatpush.msk.msrb.mxu2 %vm387_vm5, %v1340_v32 }
 0x3b0   :  { %2153 = vmatmul.msk.f32.vlgmr.msra.gmra.mxu0 %vm384_vm6, %v2677_v46 }
 0x3b1   :  { %1482 = vmatpush.msra.mxu2 %v2225_v9  ;;  %2155 = vmatmul.msk.f32.vlgmr.msra.gmra.mxu1 %vm384_vm6, %v2677_v46 }
 0x3b2   :  { %2159 = vmatmul.msk.f32.vlgmr.msra.gmra.mxu3 %vm384_vm6, %v2677_v46  ;;  %1462 = vmatpush.msra.mxu1 %v2225_v9 }
 0x3b3   :  { %1483 = vmatpush.msra.mxu2 %v2225_v9  ;;  %v1343_v5 = vpop.permute.xlu1 %1342  ;;  %v1315_v63 = vpop.permute.xlu0 %1314 }
 0x3b4   :  { %v1325_v35 = vsel %vm1322_vm13, %v1315_v63, %v1317_v26  ;;  %v1326_v36 = vsel %vm1322_vm13, %v1321_v27, %v1315_v63  ;;  %2166 = vmatmul.msk.f32.vlgmr.msrb.gmra.mxu2 %vm384_vm6, %v1343_v5  ;;  %1463 = vmatpush.msra.mxu1 %v2225_v9 }
 0x3b5   :  { %v1338_v37 = vmul.f32 %v1330_v33, %v1325_v35  ;;  %v1341_v62 = vmul.f32 %v1333_v34, %v1326_v36  ;;  %1484 = vmatpush.msra.mxu2 %v2225_v9 }
 0x3b6   :  { %1464 = vmatpush.msra.mxu1 %v2225_v9 }
 0x3b7   :  { %2161 = vmatpush.msk.msrb.mxu0 %vm387_vm5, %v1338_v37  ;;  %2167 = vmatpush.msk.msrb.mxu3 %vm387_vm5, %v1341_v62 }
 0x3b8   :  { %2162 = vmatmul.msk.f32.vlgmr.msrb.gmra.mxu0 %vm384_vm6, %v1343_v5  ;;  %1465 = vmatpush.msra.mxu1 %v2225_v9 }
 0x3b9   :  { %2164 = vmatmul.msk.f32.vlgmr.msrb.gmra.mxu1 %vm384_vm6, %v1343_v5  ;;  %1442 = vmatpush.msra.mxu0 %v2225_v9 }
 0x3ba   :  { %2168 = vmatmul.msk.f32.vlgmr.msrb.gmra.mxu3 %vm384_vm6, %v1343_v5  ;;  %1466 = vmatpush.msra.mxu1 %v2225_v9 }
 0x3bb   :  { %1502 = vmatpush.msra.mxu3 %v2225_v9  ;;  %1485 = vmatpush.msra.mxu2 %v2225_v9 }
 0x3bc   :  { %1443 = vmatpush.msra.mxu0 %v2225_v9  ;;  %1467 = vmatpush.msra.mxu1 %v2225_v9 }
 0x3bd   :  { %1503 = vmatpush.msra.mxu3 %v2225_v9  ;;  %1486 = vmatpush.msra.mxu2 %v2225_v9 }
 0x3be   :  { %1444 = vmatpush.msra.mxu0 %v2225_v9  ;;  %1468 = vmatpush.msra.mxu1 %v2225_v9 }
 0x3bf   :  { %1504 = vmatpush.msra.mxu3 %v2225_v9  ;;  %1487 = vmatpush.msra.mxu2 %v2225_v9 }
 0x3c0   :  { %1445 = vmatpush.msra.mxu0 %v2225_v9  ;;  %1469 = vmatpush.msra.mxu1 %v2225_v9 }
 0x3c1   :  { %1505 = vmatpush.msra.mxu3 %v2225_v9  ;;  %1488 = vmatpush.msra.mxu2 %v2225_v9 }
 0x3c2   :  { %1446 = vmatpush.msra.mxu0 %v2225_v9  ;;  %1470 = vmatpush.msra.mxu1 %v2225_v9 }
 0x3c3   :  { %1506 = vmatpush.msra.mxu3 %v2225_v9  ;;  %1489 = vmatpush.msra.mxu2 %v2225_v9 }
 0x3c4   :  { %1447 = vmatpush.msra.mxu0 %v2225_v9  ;;  %1471 = vmatpush.msra.mxu1 %v2225_v9 }
 0x3c5   :  { %1507 = vmatpush.msra.mxu3 %v2225_v9  ;;  %1490 = vmatpush.msra.mxu2 %v2225_v9 }
 0x3c6   :  { %1448 = vmatpush.msra.mxu0 %v2225_v9  ;;  %1472 = vmatpush.msra.mxu1 %v2225_v9 }
 0x3c7   :  { %1508 = vmatpush.msra.mxu3 %v2225_v9  ;;  %1491 = vmatpush.msra.mxu2 %v2225_v9 }
 0x3c8   :  { %1449 = vmatpush.msra.mxu0 %v2225_v9  ;;  %1473 = vmatpush.msra.mxu1 %v2225_v9 }
 0x3c9   :  { %1509 = vmatpush.msra.mxu3 %v2225_v9  ;;  %1492 = vmatpush.msra.mxu2 %v2225_v9 }
 0x3ca   :  { %1450 = vmatpush.msra.mxu0 %v2225_v9  ;;  %1474 = vmatpush.msra.mxu1 %v2225_v9 }
 0x3cb   :  { %1510 = vmatpush.msra.mxu3 %v2225_v9  ;;  %1493 = vmatpush.msra.mxu2 %v2225_v9 }
 0x3cc   :  { %1451 = vmatpush.msra.mxu0 %v2225_v9  ;;  %1475 = vmatpush.msra.mxu1 %v2225_v9 }
 0x3cd   :  { %1511 = vmatpush.msra.mxu3 %v2225_v9  ;;  %1494 = vmatpush.msra.mxu2 %v2225_v9 }
 0x3ce   :  { %1452 = vmatpush.msra.mxu0 %v2225_v9  ;;  %1476 = vmatpush.msra.mxu1 %v2225_v9 }
 0x3cf   :  { %1512 = vmatpush.msra.mxu3 %v2225_v9  ;;  %1495 = vmatpush.msra.mxu2 %v2225_v9 }
 0x3d0   :  { %1453 = vmatpush.msra.mxu0 %v2225_v9  ;;  %1477 = vmatpush.msra.mxu1 %v2225_v9 }
 0x3d1   :  { %1513 = vmatpush.msra.mxu3 %v2225_v9  ;;  %1496 = vmatpush.msra.mxu2 %v2225_v9 }
 0x3d2   :  { %1454 = vmatpush.msra.mxu0 %v2225_v9  ;;  %1546 = vmatpush.msrb.mxu1 %v2225_v9 }
 0x3d3   :  { %1514 = vmatpush.msra.mxu3 %v2225_v9  ;;  %1497 = vmatpush.msra.mxu2 %v2225_v9 }
 0x3d4   :  { %1455 = vmatpush.msra.mxu0 %v2225_v9  ;;  %1547 = vmatpush.msrb.mxu1 %v2225_v9 }
 0x3d5   :  { %1515 = vmatpush.msra.mxu3 %v2225_v9  ;;  %1566 = vmatpush.msrb.mxu2 %v2225_v9 }
 0x3d6   :  { %1456 = vmatpush.msra.mxu0 %v2225_v9  ;;  %1548 = vmatpush.msrb.mxu1 %v2225_v9 }
 0x3d7   :  { %1516 = vmatpush.msra.mxu3 %v2225_v9  ;;  %1567 = vmatpush.msrb.mxu2 %v2225_v9 }
 0x3d8   :  { %1457 = vmatpush.msra.mxu0 %v2225_v9  ;;  %1549 = vmatpush.msrb.mxu1 %v2225_v9 }
 0x3d9   :  { %1517 = vmatpush.msra.mxu3 %v2225_v9  ;;  %1568 = vmatpush.msrb.mxu2 %v2225_v9 }
 0x3da   :  { %1526 = vmatpush.msrb.mxu0 %v2225_v9  ;;  %1550 = vmatpush.msrb.mxu1 %v2225_v9 }
 0x3db   :  { %1586 = vmatpush.msrb.mxu3 %v2225_v9  ;;  %1569 = vmatpush.msrb.mxu2 %v2225_v9 }
 0x3dc   :  { %1527 = vmatpush.msrb.mxu0 %v2225_v9  ;;  %1551 = vmatpush.msrb.mxu1 %v2225_v9 }
 0x3dd   :  { %1587 = vmatpush.msrb.mxu3 %v2225_v9  ;;  %1570 = vmatpush.msrb.mxu2 %v2225_v9 }
 0x3de   :  { %1528 = vmatpush.msrb.mxu0 %v2225_v9  ;;  %1552 = vmatpush.msrb.mxu1 %v2225_v9 }
 0x3df   :  { %1588 = vmatpush.msrb.mxu3 %v2225_v9  ;;  %1571 = vmatpush.msrb.mxu2 %v2225_v9 }
 0x3e0   :  { %1529 = vmatpush.msrb.mxu0 %v2225_v9  ;;  %1553 = vmatpush.msrb.mxu1 %v2225_v9 }
 0x3e1   :  { %1589 = vmatpush.msrb.mxu3 %v2225_v9  ;;  %1572 = vmatpush.msrb.mxu2 %v2225_v9 }
 0x3e2   :  { %1530 = vmatpush.msrb.mxu0 %v2225_v9  ;;  %1554 = vmatpush.msrb.mxu1 %v2225_v9 }
 0x3e3   :  { %1590 = vmatpush.msrb.mxu3 %v2225_v9  ;;  %1573 = vmatpush.msrb.mxu2 %v2225_v9 }
 0x3e4   :  { %1531 = vmatpush.msrb.mxu0 %v2225_v9  ;;  %1555 = vmatpush.msrb.mxu1 %v2225_v9 }
 0x3e5   :  { %1591 = vmatpush.msrb.mxu3 %v2225_v9  ;;  %1574 = vmatpush.msrb.mxu2 %v2225_v9 }
 0x3e6   :  { %1532 = vmatpush.msrb.mxu0 %v2225_v9  ;;  %1556 = vmatpush.msrb.mxu1 %v2225_v9 }
 0x3e7   :  { %1592 = vmatpush.msrb.mxu3 %v2225_v9  ;;  %1575 = vmatpush.msrb.mxu2 %v2225_v9 }
 0x3e8   :  { %1533 = vmatpush.msrb.mxu0 %v2225_v9  ;;  %1557 = vmatpush.msrb.mxu1 %v2225_v9 }
 0x3e9   :  { %1593 = vmatpush.msrb.mxu3 %v2225_v9  ;;  %1576 = vmatpush.msrb.mxu2 %v2225_v9 }
 0x3ea   :  { %1534 = vmatpush.msrb.mxu0 %v2225_v9  ;;  %1558 = vmatpush.msrb.mxu1 %v2225_v9 }
 0x3eb   :  { %1594 = vmatpush.msrb.mxu3 %v2225_v9  ;;  %1577 = vmatpush.msrb.mxu2 %v2225_v9  ;;  %v457_v15 = vpop.f32.mrf.mxu2  ;;  %v477_v40 = vpop.f32.mrf.mxu3 }
 0x3ec   :  { %1535 = vmatpush.msrb.mxu0 %v2225_v9  ;;  %1559 = vmatpush.msrb.mxu1 %v2225_v9 }
 0x3ed   :  { %1595 = vmatpush.msrb.mxu3 %v2225_v9  ;;  %1578 = vmatpush.msrb.mxu2 %v2225_v9 }
 0x3ee   :  { %1536 = vmatpush.msrb.mxu0 %v2225_v9  ;;  %1560 = vmatpush.msrb.mxu1 %v2225_v9 }
 0x3ef   :  { %1596 = vmatpush.msrb.mxu3 %v2225_v9  ;;  %1579 = vmatpush.msrb.mxu2 %v2225_v9 }
 0x3f0   :  { %1537 = vmatpush.msrb.mxu0 %v2225_v9  ;;  %1561 = vmatpush.msrb.mxu1 %v2225_v9 }
 0x3f1   :  { %1597 = vmatpush.msrb.mxu3 %v2225_v9  ;;  %1580 = vmatpush.msrb.mxu2 %v2225_v9 }
 0x3f2   :  { %1538 = vmatpush.msrb.mxu0 %v2225_v9 }
 0x3f3   :  { %1598 = vmatpush.msrb.mxu3 %v2225_v9  ;;  %1581 = vmatpush.msrb.mxu2 %v2225_v9  ;;  %v551_v39 = vpop.f32.mrf.mxu2  ;;  %v571_v44 = vpop.f32.mrf.mxu3 }
 0x3f4   :  { %1539 = vmatpush.msrb.mxu0 %v2225_v9  ;;  %v552_v6 = vadd.f32 %v551_v39, %v457_v15  ;;  %v572_v23 = vadd.f32 %v571_v44, %v477_v40 }
 0x3f5   :  { %1599 = vmatpush.msrb.mxu3 %v2225_v9  ;;  %v417_v31 = vpop.f32.mrf.mxu0 }
 0x3f6   :  { %1540 = vmatpush.msrb.mxu0 %v2225_v9  ;;  %v437_v38 = vpop.f32.mrf.mxu1 }
 0x3f7   :  { %1600 = vmatpush.msrb.mxu3 %v2225_v9 }
 0x3f8   :  { %1541 = vmatpush.msrb.mxu0 %v2225_v9 }
 0x3f9   :  { %1601 = vmatpush.msrb.mxu3 %v2225_v9 }
 0x3fc   :  { %v675_v43 = vpop.f32.mrf.mxu2 }
 0x3fd   :  { %v511_v41 = vpop.f32.mrf.mxu0  ;;  %v700_v17 = vadd.f32 %v675_v43, %v552_v6 }
 0x3fe   :  { %v531_v7 = vpop.f32.mrf.mxu1  ;;  %v512_v2 = vadd.f32 %v511_v41, %v417_v31 }
 0x3ff   :  { %v532_v4 = vadd.f32 %v531_v7, %v437_v38 }
 0x405   :  { %v635_v3 = vpop.f32.mrf.mxu0  ;;  %v695_v0 = vpop.f32.mrf.mxu3 }
 0x406   :  { %v655_v45 = vpop.f32.mrf.mxu1  ;;  %v698_v13 = vadd.f32 %v635_v3, %v512_v2  ;;  %v701_v25 = vadd.f32 %v695_v0, %v572_v23 }
 0x407   :  { %v699_v16 = vadd.f32 %v655_v45, %v532_v4 }
 0x40b   :  { %v803_v46 = vpop.f32.mrf.mxu2 }
 0x40c   :  { %v828_v19 = vadd.f32 %v803_v46, %v700_v17 }
 0x40d   :  { %v763_v49 = vpop.f32.mrf.mxu0 }
 0x40e   :  { %v783_v42 = vpop.f32.mrf.mxu1  ;;  %v826_v18 = vadd.f32 %v763_v49, %v698_v13 }
 0x40f   :  { %v827_v11 = vadd.f32 %v783_v42, %v699_v16 }
 0x414   :  { %v823_v50 = vpop.f32.mrf.mxu3 }
 0x415   :  { %v903_v52 = vpop.f32.mrf.mxu2  ;;  %v863_v53 = vpop.f32.mrf.mxu0  ;;  %v829_v29 = vadd.f32 %v823_v50, %v701_v25 }
 0x416   :  { %v883_v54 = vpop.f32.mrf.mxu1  ;;  %v926_v20 = vadd.f32 %v863_v53, %v826_v18  ;;  %v928_v60 = vadd.f32 %v903_v52, %v828_v19 }
 0x417   :  { %v927_v48 = vadd.f32 %v883_v54, %v827_v11 }
 0x41c   :  { %v923_v55 = vpop.f32.mrf.mxu3 }
 0x41d   :  { %v1031_v56 = vpop.f32.mrf.mxu2  ;;  %v991_v8 = vpop.f32.mrf.mxu0  ;;  %v929_v34 = vadd.f32 %v923_v55, %v829_v29 }
 0x41e   :  { %v1011_v57 = vpop.f32.mrf.mxu1  ;;  %v1054_v22 = vadd.f32 %v991_v8, %v926_v20  ;;  %v1056_v27 = vadd.f32 %v1031_v56, %v928_v60 }
 0x41f   :  { %v1055_v26 = vadd.f32 %v1011_v57, %v927_v48 }
 0x425   :  { %v1051_v58 = vpop.f32.mrf.mxu3  ;;  %v1159_v59 = vpop.f32.mrf.mxu2 }
 0x426   :  { %v1119_v61 = vpop.f32.mrf.mxu0  ;;  %v1139_v1 = vpop.f32.mrf.mxu1  ;;  %v1184_v30 = vadd.f32 %v1159_v59, %v1056_v27  ;;  %v1057_v62 = vadd.f32 %v1051_v58, %v929_v34 }
 0x427   :  { %v1182_v28 = vadd.f32 %v1119_v61, %v1054_v22  ;;  %v1183_v12 = vadd.f32 %v1139_v1, %v1055_v26 }
 0x42d   :  { %v1179_v14 = vpop.f32.mrf.mxu3 }
 0x42e   :  { %v1247_v10 = vpop.f32.mrf.mxu0  ;;  %v1267_v21 = vpop.f32.mrf.mxu1  ;;  %v1185_v39 = vadd.f32 %v1179_v14, %v1057_v62 }
 0x42f   :  { %v1287_v24 = vpop.f32.mrf.mxu2  ;;  %v1310_v32 = vadd.f32 %v1247_v10, %v1182_v28  ;;  %v1311_v5 = vadd.f32 %v1267_v21, %v1183_v12  ;;  %v2216_v21 = vld [vmem:[%s3189_s1 + $0x4] sm:$0xf] }
 0x430   :  { %v1312_v35 = vadd.f32 %v1287_v24, %v1184_v30 }
 0x435   :  { %v1307_v33 = vpop.f32.mrf.mxu3 }
 0x436   :  { %v1375_v63 = vpop.f32.mrf.mxu0  ;;  %v1395_v37 = vpop.f32.mrf.mxu1  ;;  %v1313_v40 = vadd.f32 %v1307_v33, %v1185_v39 }
 0x437   :  { %v2898_v36 = vadd.f32 %v1375_v63, %v1310_v32  ;;  %v2900_v15 = vadd.f32 %v1395_v37, %v1311_v5  ;;  %v1415_v31 = vpop.f32.mrf.mxu2 }
 0x438   :  { %v2902_v38 = vadd.f32 %v1415_v31, %v1312_v35 }
 0x439   :  { %1458 = vmatmul.f32.vlgmr.msra.gmra.mxu0 %v2898_v36  ;;  %1478 = vmatmul.f32.vlgmr.msra.gmra.mxu1 %v2900_v15  ;;  %v1522_v43 = vmul.f32 %v2898_v36, %v2898_v36  ;;  %v1523_v44 = vmul.f32 %v2900_v15, %v2900_v15 }
 0x43a   :  { %1498 = vmatmul.f32.vlgmr.msra.gmra.mxu2 %v2902_v38  ;;  %v1524_v3 = vmul.f32 %v2902_v38, %v2902_v38 }
 0x43d   :  { %v1435_v41 = vpop.f32.mrf.mxu3 }
 0x43e   :  { %v1441_v7 = vadd.f32 %v1435_v41, %v1313_v40 }
 0x440   :  { %1518 = vmatmul.f32.vlgmr.msra.gmra.mxu3 %v1441_v7  ;;  %v1525_v45 = vmul.f32 %v1441_v7, %v1441_v7 }
 0x441   :  { %1542 = vmatmul.f32.vlgmr.msrb.gmra.mxu0 %v1522_v43  ;;  %1562 = vmatmul.f32.vlgmr.msrb.gmra.mxu1 %v1523_v44 }
 0x442   :  { %1582 = vmatmul.f32.vlgmr.msrb.gmra.mxu2 %v1524_v3 }
 0x448   :  { %1602 = vmatmul.f32.vlgmr.msrb.gmra.mxu3 %v1525_v45 }
 0x4b6   :  { %v1459_v46 = vpop.f32.mrf.mxu0  ;;  %v1479_v0 = vpop.f32.mrf.mxu1 }
 0x4b7   :  { %v1480_v42 = vadd.f32 %v1479_v0, %v1459_v46 }
 0x4bd   :  { %v1499_v49 = vpop.f32.mrf.mxu2 }
 0x4be   :  { %v1500_v52 = vadd.f32 %v1499_v49, %v1480_v42  ;;  %v1543_v53 = vpop.f32.mrf.mxu0  ;;  %v1563_v54 = vpop.f32.mrf.mxu1 }
 0x4bf   :  { %v1564_v8 = vadd.f32 %v1563_v54, %v1543_v53 }
 0x4c3   :  { %v1519_v50 = vpop.f32.mrf.mxu3 }
 0x4c4   :  { %v1520_v55 = vadd.f32 %v1519_v50, %v1500_v52 }
 0x4c5   :  { %v1583_v56 = vpop.f32.mrf.mxu2 }
 0x4c6   :  { %v1606_v57 = vmul.f32 0.001953125, %v1520_v55  ;;  %v1584_v58 = vadd.f32 %v1583_v56, %v1564_v8 }
 0x4c8   :  { %v1608_v1 = vmul.f32 %v1606_v57, %v1606_v57 }
 0x4cb   :  { %v1603_v59 = vpop.f32.mrf.mxu3 }
 0x4cc   :  { %v1604_v61 = vadd.f32 %v1603_v59, %v1584_v58 }
 0x4ce   :  { %v1607_v2 = vmul.f32 0.001953125, %v1604_v61 }
 0x4d0   :  { %v1609_v4 = vsub.f32 %v1607_v2, %v1608_v1 }
 0x4d2   :  { %v1610_v6 = vmax.f32 %v1609_v4, 0.0 }
 0x4d4   :  { %v1611_v13 = vadd.f32 1e-05, %v1610_v6 }
 0x4d6   :  { %2210 = vrsqrt.f32 %v1611_v13  ;;  %vm1618_vm15 = vweird.f32 %v1611_v13 }
 0x4dc   :  { %v2211_v16 = vpop.eup %2210 }
 0x4dd   :  { %v1613_v17 = vmul.f32 %v2211_v16, %v1611_v13  ;;  %vm1619_vm14 = vweird.f32 %v2211_v16 }
 0x4de   :  { %vm1620_vm0 = vmor %vm1618_vm15, %vm1619_vm14 }
 0x4df   :  { %v1614_v18 = vmul.f32 %v2211_v16, %v1613_v17 }
 0x4e1   :  { %v1615_v14 = vmul.f32 0.5, %v1614_v18 }
 0x4e3   :  { %v1616_v11 = vsub.f32 1.5, %v1615_v14 }
 0x4e5   :  { %v1617_v10 = vmul.f32 %v2211_v16, %v1616_v11 }
 0x4e7   :  { %v1621_v19 = vsel %vm1620_vm0, %v2211_v16, %v1617_v10 }
 0x4e8   :  { %1623 = vrot.lane.b32.xlu0 %v1621_v19, %s2226_s30 }
 0x55a   :  { %v1624_v20 = vpop.permute.xlu0 %1623 }
 0x55b   :  { %v1626_v23 = vmul.f32 %v2216_v21, %v1624_v20 }
 0x55d   :  { %1638 = vperm.xlu0 %2204, %v1626_v23   ;;  %1628 = vrot.lane.b32.xlu1 %v1626_v23, %s2227_s4 }
 0x5cf   :  { %v1629_v48 = vpop.permute.xlu1 %1628  ;;  %v1639_v25 = vpop.permute.xlu0 %1638 }
 0x5d0   :  { %v1631_v24 = vmul.f32 %v1629_v48, %v1606_v57  ;;  %v1641_v26 = vmul.f32 %v1639_v25, %v2898_v36  ;;  %v1642_v27 = vmul.f32 %v1639_v25, %v2900_v15  ;;  %v1643_v28 = vmul.f32 %v1639_v25, %v2902_v38  ;;  %v2949_v36 = vld [vmem:[%s3189_s1 + $0x10] sm:$0xff] }
 0x5d1   :  { %v1644_v29 = vmul.f32 %v1639_v25, %v1441_v7 }
 0x5d2   :  { %1633 = vrot.lane.b32.xlu2 %v1631_v24, %s2230_s8 }
 0x62c   :  { %v1634_v60 = vpop.permute.xlu2 %1633 }
 0x62d   :  { %v1636_v22 = vsub.f32 %v2216_v21, %v1634_v60 }
 0x62f   :  { %1647 = vperm.xlu1 %2205, %v1636_v22  }
 0x637   :  { %2206 = vset.pattern.permute.xlu1 %v2228_v47  ;;  %v2926_v47 = vld [vmem:[%s3189_s1 + $0x8] sm:$0xff] }
 0x6a1   :  { %v1648_v12 = vpop.permute.xlu1 %1647 }
 0x6a2   :  { %v1650_v30 = vadd.f32 %v1648_v12, %v1641_v26  ;;  %v1651_v32 = vadd.f32 %v1648_v12, %v1642_v27  ;;  %v1652_v33 = vadd.f32 %v1648_v12, %v1643_v28  ;;  %v1653_v34 = vadd.f32 %v1648_v12, %v1644_v29 }
 0x6a4   :  { %v1654_v5 = vmax.f32 %v1650_v30, 0.0  ;;  %v1655_v63 = vmax.f32 %v1651_v32, 0.0  ;;  %v1656_v35 = vmax.f32 %v1652_v33, 0.0  ;;  %v1657_v37 = vmax.f32 %v1653_v34, 0.0 }
 0x6a6   :  { %2169 = vmatpush.msk.msra.mxu0 %vm387_vm5, %v1654_v5  ;;  %2172 = vmatpush.msk.msra.mxu1 %vm387_vm5, %v1655_v63 }
 0x6a7   :  { %2175 = vmatpush.msk.msra.mxu2 %vm387_vm5, %v1656_v35  ;;  %2178 = vmatpush.msk.msra.mxu3 %vm387_vm5, %v1657_v37 }
 0x6a8   :  { %2176 = vmatmul.msk.f32.vlgmr.msra.gmra.mxu2 %vm384_vm6, %v2926_v47  ;;  %2179 = vmatmul.msk.f32.vlgmr.msra.gmra.mxu3 %vm384_vm6, %v2926_v47 }
 0x6a9   :  { %2170 = vmatmul.msk.f32.vlgmr.msra.gmra.mxu0 %vm384_vm6, %v2926_v47  ;;  %2173 = vmatmul.msk.f32.vlgmr.msra.gmra.mxu1 %vm384_vm6, %v2926_v47 }
 0x6aa   :  { %1770 = vmatpush.msrb.mxu0 %v2225_v9  ;;  %1793 = vmatpush.msrb.mxu1 %v2225_v9 }
 0x6ab   :  { %1816 = vmatpush.msrb.mxu2 %v2225_v9  ;;  %1839 = vmatpush.msrb.mxu3 %v2225_v9 }
 0x6ac   :  { %1771 = vmatpush.msrb.mxu0 %v2225_v9  ;;  %1794 = vmatpush.msrb.mxu1 %v2225_v9 }
 0x6ad   :  { %1817 = vmatpush.msrb.mxu2 %v2225_v9  ;;  %1840 = vmatpush.msrb.mxu3 %v2225_v9 }
 0x6ae   :  { %1772 = vmatpush.msrb.mxu0 %v2225_v9  ;;  %1795 = vmatpush.msrb.mxu1 %v2225_v9 }
 0x6af   :  { %1818 = vmatpush.msrb.mxu2 %v2225_v9  ;;  %1841 = vmatpush.msrb.mxu3 %v2225_v9 }
 0x6b0   :  { %2177 = vmatmul.msk.f32.gmra.mxu2 %vm384_vm6, %v2949_v36  ;;  %2180 = vmatmul.msk.f32.gmra.mxu3 %vm384_vm6, %v2949_v36 }
 0x6b1   :  { %2171 = vmatmul.msk.f32.gmra.mxu0 %vm384_vm6, %v2949_v36  ;;  %2174 = vmatmul.msk.f32.gmra.mxu1 %vm384_vm6, %v2949_v36 }
 0x6b2   :  { %1773 = vmatpush.msrb.mxu0 %v2225_v9  ;;  %1796 = vmatpush.msrb.mxu1 %v2225_v9 }
 0x6b3   :  { %1819 = vmatpush.msrb.mxu2 %v2225_v9  ;;  %1842 = vmatpush.msrb.mxu3 %v2225_v9 }
 0x6b4   :  { %1774 = vmatpush.msrb.mxu0 %v2225_v9  ;;  %1797 = vmatpush.msrb.mxu1 %v2225_v9 }
 0x6b5   :  { %1820 = vmatpush.msrb.mxu2 %v2225_v9  ;;  %1843 = vmatpush.msrb.mxu3 %v2225_v9 }
 0x6b6   :  { %1775 = vmatpush.msrb.mxu0 %v2225_v9  ;;  %1798 = vmatpush.msrb.mxu1 %v2225_v9 }
 0x6b7   :  { %1821 = vmatpush.msrb.mxu2 %v2225_v9  ;;  %1844 = vmatpush.msrb.mxu3 %v2225_v9 }
 0x6b8   :  { %1776 = vmatpush.msrb.mxu0 %v2225_v9  ;;  %1799 = vmatpush.msrb.mxu1 %v2225_v9 }
 0x6b9   :  { %1822 = vmatpush.msrb.mxu2 %v2225_v9  ;;  %1845 = vmatpush.msrb.mxu3 %v2225_v9 }
 0x6ba   :  { %1777 = vmatpush.msrb.mxu0 %v2225_v9  ;;  %1800 = vmatpush.msrb.mxu1 %v2225_v9 }
 0x6bb   :  { %1823 = vmatpush.msrb.mxu2 %v2225_v9  ;;  %1846 = vmatpush.msrb.mxu3 %v2225_v9 }
 0x6bc   :  { %1778 = vmatpush.msrb.mxu0 %v2225_v9  ;;  %1801 = vmatpush.msrb.mxu1 %v2225_v9 }
 0x6bd   :  { %1824 = vmatpush.msrb.mxu2 %v2225_v9  ;;  %1847 = vmatpush.msrb.mxu3 %v2225_v9 }
 0x6be   :  { %1779 = vmatpush.msrb.mxu0 %v2225_v9  ;;  %1802 = vmatpush.msrb.mxu1 %v2225_v9 }
 0x6bf   :  { %1825 = vmatpush.msrb.mxu2 %v2225_v9  ;;  %1848 = vmatpush.msrb.mxu3 %v2225_v9 }
 0x6c0   :  { %1780 = vmatpush.msrb.mxu0 %v2225_v9  ;;  %1803 = vmatpush.msrb.mxu1 %v2225_v9 }
 0x6c1   :  { %1826 = vmatpush.msrb.mxu2 %v2225_v9  ;;  %1849 = vmatpush.msrb.mxu3 %v2225_v9 }
 0x6c2   :  { %1781 = vmatpush.msrb.mxu0 %v2225_v9  ;;  %1804 = vmatpush.msrb.mxu1 %v2225_v9 }
 0x6c3   :  { %1827 = vmatpush.msrb.mxu2 %v2225_v9  ;;  %1850 = vmatpush.msrb.mxu3 %v2225_v9 }
 0x6c4   :  { %1782 = vmatpush.msrb.mxu0 %v2225_v9  ;;  %1805 = vmatpush.msrb.mxu1 %v2225_v9 }
 0x6c5   :  { %1828 = vmatpush.msrb.mxu2 %v2225_v9  ;;  %1851 = vmatpush.msrb.mxu3 %v2225_v9 }
 0x6c6   :  { %1783 = vmatpush.msrb.mxu0 %v2225_v9  ;;  %1806 = vmatpush.msrb.mxu1 %v2225_v9 }
 0x6c7   :  { %1829 = vmatpush.msrb.mxu2 %v2225_v9  ;;  %1852 = vmatpush.msrb.mxu3 %v2225_v9 }
 0x6c8   :  { %1784 = vmatpush.msrb.mxu0 %v2225_v9  ;;  %1807 = vmatpush.msrb.mxu1 %v2225_v9 }
 0x6c9   :  { %1830 = vmatpush.msrb.mxu2 %v2225_v9  ;;  %1853 = vmatpush.msrb.mxu3 %v2225_v9 }
 0x6ca   :  { %1785 = vmatpush.msrb.mxu0 %v2225_v9  ;;  %1808 = vmatpush.msrb.mxu1 %v2225_v9 }
 0x6cb   :  { %1831 = vmatpush.msrb.mxu2 %v2225_v9  ;;  %1854 = vmatpush.msrb.mxu3 %v2225_v9 }
 0x6cc   :  { %1870 = vmatpush.msra.mxu0 %v2225_v9  ;;  %1893 = vmatpush.msra.mxu1 %v2225_v9 }
 0x6cd   :  { %1916 = vmatpush.msra.mxu2 %v2225_v9  ;;  %1939 = vmatpush.msra.mxu3 %v2225_v9 }
 0x6ce   :  { %1871 = vmatpush.msra.mxu0 %v2225_v9  ;;  %1894 = vmatpush.msra.mxu1 %v2225_v9 }
 0x6cf   :  { %1917 = vmatpush.msra.mxu2 %v2225_v9  ;;  %1940 = vmatpush.msra.mxu3 %v2225_v9 }
 0x6d0   :  { %1872 = vmatpush.msra.mxu0 %v2225_v9  ;;  %1895 = vmatpush.msra.mxu1 %v2225_v9 }
 0x6d1   :  { %1918 = vmatpush.msra.mxu2 %v2225_v9  ;;  %1941 = vmatpush.msra.mxu3 %v2225_v9 }
 0x6d2   :  { %1873 = vmatpush.msra.mxu0 %v2225_v9  ;;  %1896 = vmatpush.msra.mxu1 %v2225_v9 }
 0x6d3   :  { %1919 = vmatpush.msra.mxu2 %v2225_v9  ;;  %1942 = vmatpush.msra.mxu3 %v2225_v9 }
 0x6d4   :  { %1874 = vmatpush.msra.mxu0 %v2225_v9  ;;  %1897 = vmatpush.msra.mxu1 %v2225_v9 }
 0x6d5   :  { %1920 = vmatpush.msra.mxu2 %v2225_v9  ;;  %1943 = vmatpush.msra.mxu3 %v2225_v9 }
 0x6d6   :  { %1875 = vmatpush.msra.mxu0 %v2225_v9  ;;  %1898 = vmatpush.msra.mxu1 %v2225_v9 }
 0x6d7   :  { %1921 = vmatpush.msra.mxu2 %v2225_v9  ;;  %1944 = vmatpush.msra.mxu3 %v2225_v9 }
 0x6d8   :  { %1876 = vmatpush.msra.mxu0 %v2225_v9  ;;  %1899 = vmatpush.msra.mxu1 %v2225_v9 }
 0x6d9   :  { %1922 = vmatpush.msra.mxu2 %v2225_v9  ;;  %1945 = vmatpush.msra.mxu3 %v2225_v9 }
 0x6da   :  { %1877 = vmatpush.msra.mxu0 %v2225_v9  ;;  %1900 = vmatpush.msra.mxu1 %v2225_v9 }
 0x6db   :  { %1923 = vmatpush.msra.mxu2 %v2225_v9  ;;  %1946 = vmatpush.msra.mxu3 %v2225_v9 }
 0x6dc   :  { %1878 = vmatpush.msra.mxu0 %v2225_v9  ;;  %1901 = vmatpush.msra.mxu1 %v2225_v9 }
 0x6dd   :  { %1924 = vmatpush.msra.mxu2 %v2225_v9  ;;  %1947 = vmatpush.msra.mxu3 %v2225_v9 }
 0x6de   :  { %1879 = vmatpush.msra.mxu0 %v2225_v9  ;;  %1902 = vmatpush.msra.mxu1 %v2225_v9 }
 0x6df   :  { %1925 = vmatpush.msra.mxu2 %v2225_v9  ;;  %1948 = vmatpush.msra.mxu3 %v2225_v9 }
 0x6e0   :  { %1880 = vmatpush.msra.mxu0 %v2225_v9  ;;  %1903 = vmatpush.msra.mxu1 %v2225_v9 }
 0x6e1   :  { %1926 = vmatpush.msra.mxu2 %v2225_v9  ;;  %1949 = vmatpush.msra.mxu3 %v2225_v9 }
 0x6e2   :  { %1881 = vmatpush.msra.mxu0 %v2225_v9  ;;  %1904 = vmatpush.msra.mxu1 %v2225_v9 }
 0x6e3   :  { %1927 = vmatpush.msra.mxu2 %v2225_v9  ;;  %1950 = vmatpush.msra.mxu3 %v2225_v9 }
 0x6e4   :  { %1882 = vmatpush.msra.mxu0 %v2225_v9  ;;  %1905 = vmatpush.msra.mxu1 %v2225_v9 }
 0x6e5   :  { %1928 = vmatpush.msra.mxu2 %v2225_v9  ;;  %1951 = vmatpush.msra.mxu3 %v2225_v9 }
 0x6e6   :  { %1883 = vmatpush.msra.mxu0 %v2225_v9  ;;  %1906 = vmatpush.msra.mxu1 %v2225_v9 }
 0x6e7   :  { %1929 = vmatpush.msra.mxu2 %v2225_v9  ;;  %1952 = vmatpush.msra.mxu3 %v2225_v9 }
 0x6e8   :  { %1884 = vmatpush.msra.mxu0 %v2225_v9  ;;  %1907 = vmatpush.msra.mxu1 %v2225_v9 }
 0x6e9   :  { %1930 = vmatpush.msra.mxu2 %v2225_v9  ;;  %1953 = vmatpush.msra.mxu3 %v2225_v9 }
 0x6ea   :  { %1885 = vmatpush.msra.mxu0 %v2225_v9  ;;  %1908 = vmatpush.msra.mxu1 %v2225_v9 }
 0x6eb   :  { %1931 = vmatpush.msra.mxu2 %v2225_v9  ;;  %1954 = vmatpush.msra.mxu3 %v2225_v9 }
 0x726   :  { %v3081_v62 = vpop.f32.mrf.mxu0  ;;  %v3083_v15 = vpop.f32.mrf.mxu1 }
 0x727   :  { %1786 = vmatmul.f32.vlgmr.msrb.gmra.mxu0 %v3081_v62  ;;  %1809 = vmatmul.f32.vlgmr.msrb.gmra.mxu1 %v3083_v15  ;;  %v1862_v7 = vmul.f32 %v3081_v62, %v3081_v62  ;;  %v1863_v43 = vmul.f32 %v3083_v15, %v3083_v15 }
 0x72b   :  { %v3087_v31 = vpop.f32.mrf.mxu2  ;;  %v3089_v38 = vpop.f32.mrf.mxu3 }
 0x72c   :  { %1832 = vmatmul.f32.vlgmr.msrb.gmra.mxu2 %v3087_v31  ;;  %1855 = vmatmul.f32.vlgmr.msrb.gmra.mxu3 %v3089_v38  ;;  %v1864_v44 = vmul.f32 %v3087_v31, %v3087_v31  ;;  %v1865_v3 = vmul.f32 %v3089_v38, %v3089_v38 }
 0x72e   :  { %v3093_v39 = vpop.f32.mrf.mxu0  ;;  %v3095_v40 = vpop.f32.mrf.mxu1 }
 0x72f   :  { %1789 = vmatmul.f32.gmra.mxu0 %v3093_v39  ;;  %1812 = vmatmul.f32.gmra.mxu1 %v3095_v40  ;;  %v1866_v45 = vmul.f32 %v3093_v39, %v3093_v39  ;;  %v1867_v46 = vmul.f32 %v3095_v40, %v3095_v40 }
 0x733   :  { %v3099_v9 = vpop.f32.mrf.mxu2  ;;  %v3101_v41 = vpop.f32.mrf.mxu3 }
 0x734   :  { %1835 = vmatmul.f32.gmra.mxu2 %v3099_v9  ;;  %1858 = vmatmul.f32.gmra.mxu3 %v3101_v41  ;;  %v1868_v0 = vmul.f32 %v3099_v9, %v3099_v9  ;;  %v1869_v49 = vmul.f32 %v3101_v41, %v3101_v41 }
 0x737   :  { %1886 = vmatmul.f32.vlgmr.msra.gmra.mxu0 %v1862_v7  ;;  %1909 = vmatmul.f32.vlgmr.msra.gmra.mxu1 %v1863_v43 }
 0x73c   :  { %1932 = vmatmul.f32.vlgmr.msra.gmra.mxu2 %v1864_v44  ;;  %1955 = vmatmul.f32.vlgmr.msra.gmra.mxu3 %v1865_v3 }
 0x73f   :  { %1889 = vmatmul.f32.gmra.mxu0 %v1866_v45  ;;  %1912 = vmatmul.f32.gmra.mxu1 %v1867_v46 }
 0x744   :  { %1935 = vmatmul.f32.gmra.mxu2 %v1868_v0  ;;  %1958 = vmatmul.f32.gmra.mxu3 %v1869_v49 }
 0x7a4   :  { %v1787_v42 = vpop.f32.mrf.mxu0  ;;  %v1810_v50 = vpop.f32.mrf.mxu1 }
 0x7a5   :  { %v1811_v56 = vadd.f32 %v1810_v50, %v1787_v42 }
 0x7ac   :  { %v1790_v52 = vpop.f32.mrf.mxu0  ;;  %v1813_v53 = vpop.f32.mrf.mxu1 }
 0x7ad   :  { %v1814_v1 = vadd.f32 %v1813_v53, %v1790_v52 }
 0x7af   :  { %v1833_v54 = vpop.f32.mrf.mxu2  ;;  %v1856_v55 = vpop.f32.mrf.mxu3 }
 0x7b0   :  { %v1834_v58 = vadd.f32 %v1833_v54, %v1811_v56 }
 0x7b2   :  { %v1857_v2 = vadd.f32 %v1856_v55, %v1834_v58 }
 0x7b4   :  { %v1887_v59 = vpop.f32.mrf.mxu0  ;;  %v1910_v61 = vpop.f32.mrf.mxu1  ;;  %v1962_v16 = vmul.f32 0.001953125, %v1857_v2 }
 0x7b5   :  { %v1911_v4 = vadd.f32 %v1910_v61, %v1887_v59 }
 0x7b6   :  { %v1966_v19 = vmul.f32 %v1962_v16, %v1962_v16 }
 0x7b7   :  { %v1836_v8 = vpop.f32.mrf.mxu2  ;;  %v1859_v57 = vpop.f32.mrf.mxu3 }
 0x7b8   :  { %v1837_v17 = vadd.f32 %v1836_v8, %v1814_v1 }
 0x7ba   :  { %v1860_v20 = vadd.f32 %v1859_v57, %v1837_v17 }
 0x7bc   :  { %v1890_v11 = vpop.f32.mrf.mxu0  ;;  %v1913_v10 = vpop.f32.mrf.mxu1  ;;  %v1963_v60 = vmul.f32 0.001953125, %v1860_v20 }
 0x7bd   :  { %v1914_v23 = vadd.f32 %v1913_v10, %v1890_v11 }
 0x7be   :  { %v1967_v29 = vmul.f32 %v1963_v60, %v1963_v60 }
 0x7bf   :  { %v1933_v6 = vpop.f32.mrf.mxu2  ;;  %v1956_v13 = vpop.f32.mrf.mxu3 }
 0x7c0   :  { %v1934_v18 = vadd.f32 %v1933_v6, %v1911_v4 }
 0x7c2   :  { %v1957_v14 = vadd.f32 %v1956_v13, %v1934_v18 }
 0x7c4   :  { %v1964_v21 = vmul.f32 0.001953125, %v1957_v14 }
 0x7c6   :  { %v1968_v48 = vsub.f32 %v1964_v21, %v1966_v19 }
 0x7c7   :  { %v1936_v24 = vpop.f32.mrf.mxu2  ;;  %v1959_v26 = vpop.f32.mrf.mxu3 }
 0x7c8   :  { %v1970_v22 = vmax.f32 %v1968_v48, 0.0  ;;  %v1937_v25 = vadd.f32 %v1936_v24, %v1914_v23 }
 0x7ca   :  { %v1972_v27 = vadd.f32 1e-05, %v1970_v22  ;;  %v1960_v28 = vadd.f32 %v1959_v26, %v1937_v25 }
 0x7cc   :  { %2212 = vrsqrt.f32 %v1972_v27  ;;  %v1965_v12 = vmul.f32 0.001953125, %v1960_v28  ;;  %vm1980_vm2 = vweird.f32 %v1972_v27 }
 0x7ce   :  { %v1969_v30 = vsub.f32 %v1965_v12, %v1967_v29 }
 0x7d0   :  { %v1971_v32 = vmax.f32 %v1969_v30, 0.0 }
 0x7d2   :  { %v2213_v33 = vpop.eup %2212  ;;  %v1973_v34 = vadd.f32 1e-05, %v1971_v32 }
 0x7d3   :  { %v1975_v5 = vmul.f32 %v2213_v33, %v1972_v27  ;;  %vm1981_vm1 = vweird.f32 %v2213_v33 }
 0x7d4   :  { %2214 = vrsqrt.f32 %v1973_v34  ;;  %vm1982_vm3 = vmor %vm1980_vm2, %vm1981_vm1  ;;  %vm1990_vm5 = vweird.f32 %v1973_v34 }
 0x7d5   :  { %v1976_v63 = vmul.f32 %v2213_v33, %v1975_v5 }
 0x7d7   :  { %v1977_v35 = vmul.f32 0.5, %v1976_v63 }
 0x7d9   :  { %v1978_v37 = vsub.f32 1.5, %v1977_v35 }
 0x7da   :  { %v2215_v7 = vpop.eup %2214 }
 0x7db   :  { %v1985_v43 = vmul.f32 %v2215_v7, %v1973_v34  ;;  %v1979_v44 = vmul.f32 %v2213_v33, %v1978_v37  ;;  %vm1991_vm4 = vweird.f32 %v2215_v7 }
 0x7dc   :  { %vm1992_vm6 = vmor %vm1990_vm5, %vm1991_vm4 }
 0x7dd   :  { %v1983_v3 = vsel %vm1982_vm3, %v2213_v33, %v1979_v44  ;;  %v1986_v45 = vmul.f32 %v2215_v7, %v1985_v43 }
 0x7de   :  { %1996 = vrot.lane.b32.xlu2 %v1983_v3, %s2226_s30 }
 0x7df   :  { %v1987_v46 = vmul.f32 0.5, %v1986_v45 }
 0x7e1   :  { %v1988_v0 = vsub.f32 1.5, %v1987_v46 }
 0x7e3   :  { %v1989_v49 = vmul.f32 %v2215_v7, %v1988_v0 }
 0x7e5   :  { %v1993_v42 = vsel %vm1992_vm6, %v2215_v7, %v1989_v49 }
 0x7e6   :  { %1998 = vrot.lane.b32.xlu1 %v1993_v42, %s2226_s30 }
 0x838   :  { %v1997_v50 = vpop.permute.xlu2 %1996 }
 0x839   :  { %v2002_v52 = vmul.f32 %v1997_v50, %v2926_v47 }
 0x83b   :  { %2006 = vrot.lane.b32.xlu2 %v2002_v52, %s2227_s4 }
 0x858   :  { %v1999_v53 = vpop.permute.xlu1 %1998 }
 0x859   :  { %v2003_v54 = vmul.f32 %v1999_v53, %v2949_v36 }
 0x85b   :  { %2008 = vrot.lane.b32.xlu0 %v2003_v54, %s2227_s4 }
 0x863   :  { %2025 = vperm.xlu0 %2204, %v2002_v52  }
 0x86b   :  { %2207 = vset.pattern.permute.xlu0 %v2234_v51 }
 0x895   :  { %v2007_v55 = vpop.permute.xlu2 %2006 }
 0x896   :  { %v2012_v56 = vmul.f32 %v2007_v55, %v1962_v16 }
 0x898   :  { %2016 = vrot.lane.b32.xlu1 %v2012_v56, %s2230_s8 }
 0x8a0   :  { %2029 = vperm.xlu1 %2206, %v2003_v54  }
 0x8cd   :  { %v2009_v8 = vpop.permute.xlu0 %2008 }
 0x8ce   :  { %v2013_v57 = vmul.f32 %v2009_v8, %v1963_v60 }
 0x8d0   :  { %2018 = vrot.lane.b32.xlu2 %v2013_v57, %s2230_s8 }
 0x8d5   :  { %v2026_v2 = vpop.permute.xlu0 %2025 }
 0x8d6   :  { %v2032_v51 = vmul.f32 %v2026_v2, %v3081_v62  ;;  %v2033_v4 = vmul.f32 %v2026_v2, %v3083_v15  ;;  %v2034_v6 = vmul.f32 %v2026_v2, %v3087_v31  ;;  %v2035_v13 = vmul.f32 %v2026_v2, %v3089_v38  ;;  %v2218_v62 = vld [vmem:[%s3188_s0 + $0x8] sm:$0xff]  ;;  %v2219_v15 = vld [vmem:[%s3188_s0 + $0x10] sm:$0xff]  ;;  %v2220_v38 = vld [vmem:[%s3188_s0 + $0x18] sm:$0xff] }
 0x90a   :  { %v2017_v58 = vpop.permute.xlu1 %2016 }
 0x90b   :  { %v2022_v59 = vsub.f32 %v2926_v47, %v2017_v58  ;;  %v2217_v47 = vld [vmem:[%s3188_s0] sm:$0xff] }
 0x90d   :  { %2042 = vperm.xlu2 %2203, %v2022_v59  }
 0x912   :  { %v2030_v24 = vpop.permute.xlu1 %2029 }
 0x913   :  { %v2036_v60 = vmul.f32 %v2030_v24, %v3093_v39  ;;  %v2037_v22 = vmul.f32 %v2030_v24, %v3095_v40  ;;  %v2038_v25 = vmul.f32 %v2030_v24, %v3099_v9  ;;  %v2039_v26 = vmul.f32 %v2030_v24, %v3101_v41 }
 0x92a   :  { %v2019_v61 = vpop.permute.xlu2 %2018 }
 0x92b   :  { %v2023_v1 = vsub.f32 %v2949_v36, %v2019_v61 }
 0x92d   :  { %2047 = vperm.xlu0 %2207, %v2023_v1  }
 0x967   :  { %v2043_v16 = vpop.permute.xlu2 %2042 }
 0x968   :  { %v2050_v17 = vadd.f32 %v2043_v16, %v2032_v51  ;;  %v2051_v18 = vadd.f32 %v2043_v16, %v2033_v4  ;;  %v2052_v14 = vadd.f32 %v2043_v16, %v2034_v6  ;;  %v2053_v11 = vadd.f32 %v2043_v16, %v2035_v13 }
 0x96a   :  { %v2058_v36 = vadd.f32 %v2217_v47, %v2050_v17  ;;  %v2059_v10 = vadd.f32 %v2218_v62, %v2051_v18  ;;  %v2060_v31 = vadd.f32 %v2219_v15, %v2052_v14  ;;  %v2061_v19 = vadd.f32 %v2220_v38, %v2053_v11 }
 0x96c   :  { %v2066_v20 = vmax.f32 %v2058_v36, 0.0  ;;  %v2067_v21 = vmax.f32 %v2059_v10, 0.0  ;;  %v2068_v23 = vmax.f32 %v2060_v31, 0.0  ;;  %v2069_v48 = vmax.f32 %v2061_v19, 0.0 }
 0x96e   :  { %2074 = vst [vmem:[%s3191_s3] sm:$0xff] %v2066_v20 }
 0x96f   :  { %2075 = vst [vmem:[%s3191_s3 + $0x8] sm:$0xff] %v2067_v21 }
 0x970   :  { %2076 = vst [vmem:[%s3191_s3 + $0x10] sm:$0xff] %v2068_v23 }
 0x971   :  { %2077 = vst [vmem:[%s3191_s3 + $0x18] sm:$0xff] %v2069_v48 }
 0x978   :  { %v2221_v32 = vld [vmem:[%s3188_s0 + $0x20] sm:$0xff]  ;;  %v2222_v39 = vld [vmem:[%s3188_s0 + $0x28] sm:$0xff]  ;;  %v2223_v40 = vld [vmem:[%s3188_s0 + $0x30] sm:$0xff] }
 0x979   :  { %v2224_v41 = vld [vmem:[%s3188_s0 + $0x38] sm:$0xff] }
 0x99f   :  { %v2048_v27 = vpop.permute.xlu0 %2047 }
 0x9a0   :  { %v2054_v28 = vadd.f32 %v2048_v27, %v2036_v60  ;;  %v2055_v29 = vadd.f32 %v2048_v27, %v2037_v22  ;;  %v2056_v12 = vadd.f32 %v2048_v27, %v2038_v25  ;;  %v2057_v30 = vadd.f32 %v2048_v27, %v2039_v26 }
 0x9a2   :  { %v2062_v33 = vadd.f32 %v2221_v32, %v2054_v28  ;;  %v2063_v34 = vadd.f32 %v2222_v39, %v2055_v29  ;;  %v2064_v9 = vadd.f32 %v2223_v40, %v2056_v12  ;;  %v2065_v5 = vadd.f32 %v2224_v41, %v2057_v30 }
 0x9a4   :  { %v2070_v63 = vmax.f32 %v2062_v33, 0.0  ;;  %v2071_v35 = vmax.f32 %v2063_v34, 0.0  ;;  %v2072_v37 = vmax.f32 %v2064_v9, 0.0  ;;  %v2073_v7 = vmax.f32 %v2065_v5, 0.0 }
 0x9a6   :  { %2078 = vst [vmem:[%s3191_s3 + $0x20] sm:$0xff] %v2070_v63 }
 0x9a7   :  { %2079 = vst [vmem:[%s3191_s3 + $0x28] sm:$0xff] %v2071_v35 }
 0x9a8   :  { %2080 = vst [vmem:[%s3191_s3 + $0x30] sm:$0xff] %v2072_v37 }
 0x9a9   :  { %2081 = vst [vmem:[%s3191_s3 + $0x38] sm:$0xff] %v2073_v7 }

</bundles_post_ra>
